<compile_context>
chip_gen: v5e
topology: v5e:2x2
jax: 0.10.0
libtpu: 0.0.40
codegen_flags: <defaults>
</compile_context>

<pallas_src>
import jax
import jax.numpy as jnp
from jax.experimental import pallas as pl
from jax.experimental.pallas import tpu as pltpu

LATENT = 6
IN_DIM = 6
OUT_DIM = 6
ENC_HIDDEN = 2 * LATENT      # 12
DEC_HIDDEN = 2 * LATENT      # 12

GROUP = 16                   # lanes per packed sample
VAR_OFF = 8                  # per-group lane offset of eps (input) / raw-var & var (outputs)
NUM_LAYERS = 6               # enc1, enc2, enc3(combined head), dec1, dec2, dec3
TB_MAX = 1024                # max batch-row tile (rows of NG samples each)


def _pick_lanes():
    """256-lane packing fills the 256x256 MXU on v6e/v7x; 128 for v5e-and-older."""
    try:
        kind = jax.devices()[0].device_kind.lower()
    except Exception:
        return 256
    if any(v in kind for v in ("v2", "v3", "v4", "v5")):
        return 128
    return 256


LANES = _pick_lanes()
NG = LANES // GROUP          # packed samples per row


def vae_kernel(xin_ref, w_ref, b_ref, recon_ref, mv_ref):
    # xin: (TB, LANES) f32; per 16-lane group: x in lanes 0..5, eps in lanes 8..13, rest 0.
    xin = xin_ref[...]
    biases = b_ref[...]                        # (8, LANES) f32, rows 0..5 used

    # Constant per-lane mask (one sublane row; jnp.where broadcasts it over sublanes):
    # True for group offsets 0..7 (mean / x half), False for 8..15 (var / eps half).
    lane = jax.lax.broadcasted_iota(jnp.int32, (1, xin.shape[1]), 1)
    mean_lanes = (lane & (GROUP - 1)) < VAR_OFF

    def linear(a, j):
        # bf16 operands on the MXU, f32 accumulation; bias add stays f32.
        acc = jnp.dot(a.astype(jnp.bfloat16), w_ref[j],
                      preferred_element_type=jnp.float32)
        return acc + biases[j:j + 1, :]

    # ---- Encoder ----
    h = jnp.maximum(linear(xin, 0), 0.0)       # eps lanes hit zero weight rows -> ignored
    h = jnp.maximum(linear(h, 1), 0.0)
    enc = linear(h, 2)                          # per group: mean @ 0..5, raw var @ 8..13
    sp = jnp.logaddexp(enc, 0.0)                # softplus -> z_var @ 8..13 per group

    # Packed (mean | var) output: mean in lanes 0..5, softplus(var) in lanes 8..13.
    mv_ref[...] = jnp.where(mean_lanes, enc, sp)

    # ---- Reparameterize ----
    # Keep z split across lanes: mean @ 0..5, sqrt(var)*eps @ 8..13.  The decoder fc1
    # block-diagonal weight has W1d rows at BOTH offsets, so the matmul sums the two
    # contributions into exactly z @ W1d (no cross-lane shuffle).  NOTE: relies on enc
    # being exactly zero at group lanes 6..7 (zero weight columns / zero bias there).
    z_split = jnp.where(mean_lanes, enc, jnp.sqrt(sp) * xin)

    # ---- Decoder ----
    d = jnp.maximum(linear(z_split, 3), 0.0)
    d = jnp.maximum(linear(d, 4), 0.0)
    recon_ref[...] = jax.nn.sigmoid(linear(d, 5))


# ---------------------------------------------------------------------------
# Parameter init (matches torch.nn.Linear default uniform init; weights stored
# as [in_features, out_features], i.e. transposed vs torch).
# ---------------------------------------------------------------------------
def _linear_params(key, fan_in, fan_out):
    kw, kb = jax.random.split(key)
    bound = 1.0 / jnp.sqrt(jnp.float32(fan_in))
    w = jax.random.uniform(kw, (fan_in, fan_out), jnp.float32, -bound, bound)
    b = jax.random.uniform(kb, (fan_out,), jnp.float32, -bound, bound)
    return w, b


def init_vae_params(key):
    ks = jax.random.split(key, 6)
    return {
        "enc_fc1": _linear_params(ks[0], IN_DIM, ENC_HIDDEN),
        "enc_fc2": _linear_params(ks[1], ENC_HIDDEN, ENC_HIDDEN),
        "enc_fc3": _linear_params(ks[2], ENC_HIDDEN, 2 * LATENT),
        "dec_fc1": _linear_params(ks[3], LATENT, DEC_HIDDEN),
        "dec_fc2": _linear_params(ks[4], DEC_HIDDEN, DEC_HIDDEN),
        "dec_fc3": _linear_params(ks[5], DEC_HIDDEN, OUT_DIM),
    }


# ---------------------------------------------------------------------------
# Packed-weight construction helpers (tiny; executed once per jit trace).
# ---------------------------------------------------------------------------
def _group_tile(w, row_off=0, col_off=0):
    t = jnp.zeros((GROUP, GROUP), jnp.float32)
    return t.at[row_off:row_off + w.shape[0], col_off:col_off + w.shape[1]].set(w)


def _block_diag(tile):
    # NG copies of the 16x16 tile on the diagonal of a LANES x LANES matrix.
    return jnp.kron(jnp.eye(NG, dtype=jnp.float32), tile)


def _tiled_bias(parts):
    t = jnp.zeros((GROUP,), jnp.float32)
    for b, off in parts:
        t = t.at[off:off + b.shape[0]].set(b)
    return jnp.tile(t, NG)


def _round_up(a, m):
    return ((a + m - 1) // m) * m


@jax.jit
def vae_forward(params, x, eps):
    """x: [N, 6] float32, eps: [N, 6] float32 (the randn noise for reparameterize)."""
    n = x.shape[0]

    rows_needed = -(-n // NG)                  # rows of NG packed samples
    if rows_needed <= 64:
        # Small batch: one grid step, minimal sublane padding.
        tb = max(8, _round_up(rows_needed, 8))
        n_rows = tb
    else:
        # Large batch: cap the tile so the grid always has >= 2 "parallel" steps
        # (both v7x TensorCores get work), up to TB_MAX rows per step.
        tb = min(TB_MAX, _round_up(-(-rows_needed // 2), 8))
        n_rows = _round_up(rows_needed, tb)
    n_samp = n_rows * NG

    w1e, b1e = params["enc_fc1"]
    w2e, b2e = params["enc_fc2"]
    w3e, b3e = params["enc_fc3"]
    w1d, b1d = params["dec_fc1"]
    w2d, b2d = params["dec_fc2"]
    w3d, b3d = params["dec_fc3"]

    w_tiles = [
        _group_tile(w1e, 0, 0),                                   # enc fc1: x rows 0..5 -> cols 0..11
        _group_tile(w2e, 0, 0),                                   # enc fc2
        _group_tile(w3e[:, :LATENT], 0, 0)                        # combined head: mean -> cols 0..5
        + _group_tile(w3e[:, LATENT:], 0, VAR_OFF),               #                raw var -> cols 8..13
        _group_tile(w1d, 0, 0) + _group_tile(w1d, VAR_OFF, 0),    # dec fc1 reads mean@0..5 + sqrt(var)*eps@8..13
        _group_tile(w2d, 0, 0),                                   # dec fc2
        _group_tile(w3d, 0, 0),                                   # dec fc3
    ]
    # bf16 weights for the MXU (accumulation stays f32 inside the kernel).
    w_stack = jnp.stack([_block_diag(t) for t in w_tiles]).astype(jnp.bfloat16)

    b_rows = jnp.stack([
        _tiled_bias([(b1e, 0)]),
        _tiled_bias([(b2e, 0)]),
        _tiled_bias([(b3e[:LATENT], 0), (b3e[LATENT:], VAR_OFF)]),
        _tiled_bias([(b1d, 0)]),
        _tiled_bias([(b2d, 0)]),
        _tiled_bias([(b3d, 0)]),
    ])
    b_stack = jnp.zeros((8, LANES), jnp.float32).at[:NUM_LAYERS, :].set(b_rows)

    # Pack x and eps into one row per NG samples with a single pad+concat+reshape fusion
    # (sample s uses lanes [GROUP*(s%NG), GROUP*(s%NG)+GROUP)).
    pad = n_samp - n
    x_pad = jnp.pad(x, ((0, pad), (0, VAR_OFF - IN_DIM)))                 # (n_samp, 8)
    e_pad = jnp.pad(eps, ((0, pad), (0, GROUP - VAR_OFF - LATENT)))       # (n_samp, 8)
    packed = jnp.concatenate([x_pad, e_pad], axis=1).reshape(n_rows, LANES)

    act_spec = pl.BlockSpec((tb, LANES), lambda i: (i, 0))
    w_spec = pl.BlockSpec((NUM_LAYERS, LANES, LANES), lambda i: (0, 0, 0))
    b_spec = pl.BlockSpec((8, LANES), lambda i: (0, 0))

    recon_p, mv_p = pl.pallas_call(
        vae_kernel,
        out_shape=(
            jax.ShapeDtypeStruct((n_rows, LANES), jnp.float32),   # recon packed
            jax.ShapeDtypeStruct((n_rows, LANES), jnp.float32),   # (mean | var) packed
        ),
        grid_spec=pltpu.PrefetchScalarGridSpec(
            num_scalar_prefetch=0,
            grid=(n_rows // tb,),
            in_specs=[act_spec, w_spec, b_spec],
            out_specs=(act_spec, act_spec),
        ),
        compiler_params=pltpu.CompilerParams(
            dimension_semantics=("parallel",),
            vmem_limit_bytes=48 * 1024 * 1024),
    )(packed, w_stack, b_stack)

    recon_s = recon_p.reshape(n_samp, GROUP)
    mv_s = mv_p.reshape(n_samp, GROUP)
    x_recon = recon_s[:n, :OUT_DIM]
    z_mean = mv_s[:n, :LATENT]
    z_var = mv_s[:n, VAR_OFF:VAR_OFF + LATENT]
    return x_recon, z_mean, z_var


def vae_forward_ref(params, x, eps):
    """Pure-JAX f32 reference (matches the PyTorch module) for correctness checking."""
    w1e, b1e = params["enc_fc1"]
    w2e, b2e = params["enc_fc2"]
    w3e, b3e = params["enc_fc3"]
    w1d, b1d = params["dec_fc1"]
    w2d, b2d = params["dec_fc2"]
    w3d, b3d = params["dec_fc3"]

    h = jnp.maximum(x @ w1e + b1e, 0.0)
    h = jnp.maximum(h @ w2e + b2e, 0.0)
    enc = h @ w3e + b3e
    z_mean = enc[:, :LATENT]
    z_var = jnp.logaddexp(enc[:, LATENT:], 0.0)
    z = z_mean + jnp.sqrt(z_var) * eps
    d = jnp.maximum(z @ w1d + b1d, 0.0)
    d = jnp.maximum(d @ w2d + b2d, 0.0)
    x_recon = jax.nn.sigmoid(d @ w3d + b3d)
    return x_recon, z_mean, z_var


if __name__ == "__main__":
    key = jax.random.PRNGKey(0)
    k_params, k_x, k_eps = jax.random.split(key, 3)

    params = init_vae_params(k_params)

    N = 50  # deliberately not a multiple of the per-row packing to exercise padding
    x = jax.random.normal(k_x, (N, IN_DIM), jnp.float32)
    # torch.randn equivalent for the reparameterization trick, passed explicitly so
    # the kernel is deterministic and checkable against the pure-JAX reference.
    eps = jax.random.normal(k_eps, (N, LATENT), jnp.float32)

    x_recon, z_mean, z_var = vae_forward(params, x, eps)
    jax.block_until_ready((x_recon, z_mean, z_var))

    r_recon, r_mean, r_var = vae_forward_ref(params, x, eps)
    assert x_recon.shape == (N, OUT_DIM) and z_mean.shape == (N, LATENT) and z_var.shape == (N, LATENT)
    # bf16 matmul operands (f32 accumulation) vs the pure-f32 reference -> relaxed tolerance.
    assert jnp.allclose(x_recon, r_recon, atol=5e-2), "recon mismatch"
    assert jnp.allclose(z_mean, r_mean, atol=5e-2), "mean mismatch"
    assert jnp.allclose(z_var, r_var, atol=5e-2), "var mismatch"

    print("KERNEL_OK")
</pallas_src>

<mosaic_0001>
module attributes {stable_mosaic.version = 11 : i64} {
  func.func @vae_kernel(%arg0: i32, %arg1: memref<8x256xf32, #tpu.memory_space<vmem>>, %arg2: memref<6x256x256xbf16, #tpu.memory_space<vmem>>, %arg3: memref<8x256xf32, #tpu.memory_space<vmem>>, %arg4: memref<8x256xf32, #tpu.memory_space<vmem>>, %arg5: memref<8x256xf32, #tpu.memory_space<vmem>>) attributes {dimension_semantics = [#tpu.dimension_semantics<parallel>], iteration_bounds = array<i64: 1>, scalar_prefetch = 0 : i64, scratch_operands = 0 : i64, tpu.core_type = #tpu.core_type<tc>, window_params = [{transform_indices = @transform_0, window_bounds = array<i64: 8, 256>}, {pipeline_mode = #tpu.pipeline_mode<synchronous>, transform_indices = @transform_1, window_bounds = array<i64: 6, 256, 256>}, {pipeline_mode = #tpu.pipeline_mode<synchronous>, transform_indices = @transform_2, window_bounds = array<i64: 8, 256>}, {transform_indices = @transform_3, window_bounds = array<i64: 8, 256>}, {transform_indices = @transform_4, window_bounds = array<i64: 8, 256>}]} {
    %c0 = arith.constant 0 : index
    %c0_0 = arith.constant 0 : index
    %0 = vector.load %arg1[%c0, %c0_0] : memref<8x256xf32, #tpu.memory_space<vmem>>, vector<8x256xf32>
    %c0_1 = arith.constant 0 : index
    %c0_2 = arith.constant 0 : index
    %1 = vector.load %arg3[%c0_1, %c0_2] : memref<8x256xf32, #tpu.memory_space<vmem>>, vector<8x256xf32>
    %2 = tpu.iota {dimensions = array<i32: 1>} : vector<1x256xi32>
    %c15_i32 = arith.constant 15 : i32
    %3 = vector.broadcast %c15_i32 : i32 to vector<1x256xi32>
    %4 = arith.andi %2, %3 : vector<1x256xi32>
    %c8_i32 = arith.constant 8 : i32
    %5 = vector.broadcast %c8_i32 : i32 to vector<1x256xi32>
    %6 = arith.cmpi slt, %4, %5 : vector<1x256xi32>
    %7 = arith.truncf %0 : vector<8x256xf32> to vector<8x256xbf16>
    %c0_3 = arith.constant 0 : index
    %c0_4 = arith.constant 0 : index
    %c0_5 = arith.constant 0 : index
    %8 = vector.load %arg2[%c0_3, %c0_4, %c0_5] : memref<6x256x256xbf16, #tpu.memory_space<vmem>>, vector<1x256x256xbf16>
    %9 = vector.shape_cast %8 : vector<1x256x256xbf16> to vector<256x256xbf16>
    %cst = arith.constant dense<0.000000e+00> : vector<8x256xf32>
    %10 = tpu.matmul %7, %9, %cst {dimension_numbers = #tpu.dot_dimension_numbers<[1], [0], [0], [1], [0, 0, 1, 1], [], []>} : vector<8x256xbf16>, vector<256x256xbf16>, vector<8x256xf32> -> vector<8x256xf32>
    %11 = vector.extract_strided_slice %1 {offsets = [0, 0], sizes = [1, 256], strides = [1, 1]} : vector<8x256xf32> to vector<1x256xf32>
    %12 = vector.broadcast %11 : vector<1x256xf32> to vector<8x256xf32>
    %13 = arith.addf %10, %12 : vector<8x256xf32>
    %cst_6 = arith.constant 0.000000e+00 : f32
    %14 = vector.broadcast %cst_6 : f32 to vector<8x256xf32>
    %15 = arith.maximumf %13, %14 : vector<8x256xf32>
    %16 = arith.truncf %15 : vector<8x256xf32> to vector<8x256xbf16>
    %c1 = arith.constant 1 : index
    %c0_7 = arith.constant 0 : index
    %c0_8 = arith.constant 0 : index
    %17 = vector.load %arg2[%c1, %c0_7, %c0_8] : memref<6x256x256xbf16, #tpu.memory_space<vmem>>, vector<1x256x256xbf16>
    %18 = vector.shape_cast %17 : vector<1x256x256xbf16> to vector<256x256xbf16>
    %cst_9 = arith.constant dense<0.000000e+00> : vector<8x256xf32>
    %19 = tpu.matmul %16, %18, %cst_9 {dimension_numbers = #tpu.dot_dimension_numbers<[1], [0], [0], [1], [0, 0, 1, 1], [], []>} : vector<8x256xbf16>, vector<256x256xbf16>, vector<8x256xf32> -> vector<8x256xf32>
    %20 = vector.extract_strided_slice %1 {offsets = [1, 0], sizes = [1, 256], strides = [1, 1]} : vector<8x256xf32> to vector<1x256xf32>
    %21 = vector.broadcast %20 : vector<1x256xf32> to vector<8x256xf32>
    %22 = arith.addf %19, %21 : vector<8x256xf32>
    %cst_10 = arith.constant 0.000000e+00 : f32
    %23 = vector.broadcast %cst_10 : f32 to vector<8x256xf32>
    %24 = arith.maximumf %22, %23 : vector<8x256xf32>
    %25 = arith.truncf %24 : vector<8x256xf32> to vector<8x256xbf16>
    %c2 = arith.constant 2 : index
    %c0_11 = arith.constant 0 : index
    %c0_12 = arith.constant 0 : index
    %26 = vector.load %arg2[%c2, %c0_11, %c0_12] : memref<6x256x256xbf16, #tpu.memory_space<vmem>>, vector<1x256x256xbf16>
    %27 = vector.shape_cast %26 : vector<1x256x256xbf16> to vector<256x256xbf16>
    %cst_13 = arith.constant dense<0.000000e+00> : vector<8x256xf32>
    %28 = tpu.matmul %25, %27, %cst_13 {dimension_numbers = #tpu.dot_dimension_numbers<[1], [0], [0], [1], [0, 0, 1, 1], [], []>} : vector<8x256xbf16>, vector<256x256xbf16>, vector<8x256xf32> -> vector<8x256xf32>
    %29 = vector.extract_strided_slice %1 {offsets = [2, 0], sizes = [1, 256], strides = [1, 1]} : vector<8x256xf32> to vector<1x256xf32>
    %30 = vector.broadcast %29 : vector<1x256xf32> to vector<8x256xf32>
    %31 = arith.addf %28, %30 : vector<8x256xf32>
    %cst_14 = arith.constant 0.000000e+00 : f32
    %32 = vector.broadcast %cst_14 : f32 to vector<8x256xf32>
    %33 = arith.maximumf %31, %32 : vector<8x256xf32>
    %34 = vector.broadcast %cst_14 : f32 to vector<8x256xf32>
    %35 = arith.subf %31, %34 : vector<8x256xf32>
    %36 = arith.cmpf one, %35, %35 : vector<8x256xf32>
    %37 = vector.broadcast %cst_14 : f32 to vector<8x256xf32>
    %38 = arith.addf %31, %37 : vector<8x256xf32>
    %39 = math.absf %35 : vector<8x256xf32>
    %cst_15 = arith.constant 0.000000e+00 : f32
    %40 = vector.broadcast %cst_15 : f32 to vector<8x256xf32>
    %41 = arith.subf %40, %39 : vector<8x256xf32>
    %42 = math.exp %41 : vector<8x256xf32>
    %43 = math.log1p %42 : vector<8x256xf32>
    %44 = arith.addf %33, %43 : vector<8x256xf32>
    %45 = arith.select %36, %38, %44 : vector<8x256xi1>, vector<8x256xf32>
    %46 = vector.shape_cast %6 : vector<1x256xi1> to vector<1x256xi1>
    %47 = vector.broadcast %46 : vector<1x256xi1> to vector<8x256xi1>
    %48 = arith.select %47, %31, %45 : vector<8x256xi1>, vector<8x256xf32>
    %c0_16 = arith.constant 0 : index
    %c0_17 = arith.constant 0 : index
    %49 = vector.load %arg5[%c0_16, %c0_17] : memref<8x256xf32, #tpu.memory_space<vmem>>, vector<8x256xf32>
    tpu.vector_store %arg5[%c0_16, %c0_17], %48 {strides = array<i32>} : memref<8x256xf32, #tpu.memory_space<vmem>>, vector<8x256xf32>,
    %50 = math.sqrt %45 : vector<8x256xf32>
    %51 = arith.mulf %50, %0 : vector<8x256xf32>
    %52 = vector.shape_cast %6 : vector<1x256xi1> to vector<1x256xi1>
    %53 = vector.broadcast %52 : vector<1x256xi1> to vector<8x256xi1>
    %54 = arith.select %53, %31, %51 : vector<8x256xi1>, vector<8x256xf32>
    %55 = arith.truncf %54 : vector<8x256xf32> to vector<8x256xbf16>
    %c3 = arith.constant 3 : index
    %c0_18 = arith.constant 0 : index
    %c0_19 = arith.constant 0 : index
    %56 = vector.load %arg2[%c3, %c0_18, %c0_19] : memref<6x256x256xbf16, #tpu.memory_space<vmem>>, vector<1x256x256xbf16>
    %57 = vector.shape_cast %56 : vector<1x256x256xbf16> to vector<256x256xbf16>
    %cst_20 = arith.constant dense<0.000000e+00> : vector<8x256xf32>
    %58 = tpu.matmul %55, %57, %cst_20 {dimension_numbers = #tpu.dot_dimension_numbers<[1], [0], [0], [1], [0, 0, 1, 1], [], []>} : vector<8x256xbf16>, vector<256x256xbf16>, vector<8x256xf32> -> vector<8x256xf32>
    %59 = vector.extract_strided_slice %1 {offsets = [3, 0], sizes = [1, 256], strides = [1, 1]} : vector<8x256xf32> to vector<1x256xf32>
    %60 = vector.broadcast %59 : vector<1x256xf32> to vector<8x256xf32>
    %61 = arith.addf %58, %60 : vector<8x256xf32>
    %cst_21 = arith.constant 0.000000e+00 : f32
    %62 = vector.broadcast %cst_21 : f32 to vector<8x256xf32>
    %63 = arith.maximumf %61, %62 : vector<8x256xf32>
    %64 = arith.truncf %63 : vector<8x256xf32> to vector<8x256xbf16>
    %c4 = arith.constant 4 : index
    %c0_22 = arith.constant 0 : index
    %c0_23 = arith.constant 0 : index
    %65 = vector.load %arg2[%c4, %c0_22, %c0_23] : memref<6x256x256xbf16, #tpu.memory_space<vmem>>, vector<1x256x256xbf16>
    %66 = vector.shape_cast %65 : vector<1x256x256xbf16> to vector<256x256xbf16>
    %cst_24 = arith.constant dense<0.000000e+00> : vector<8x256xf32>
    %67 = tpu.matmul %64, %66, %cst_24 {dimension_numbers = #tpu.dot_dimension_numbers<[1], [0], [0], [1], [0, 0, 1, 1], [], []>} : vector<8x256xbf16>, vector<256x256xbf16>, vector<8x256xf32> -> vector<8x256xf32>
    %68 = vector.extract_strided_slice %1 {offsets = [4, 0], sizes = [1, 256], strides = [1, 1]} : vector<8x256xf32> to vector<1x256xf32>
    %69 = vector.broadcast %68 : vector<1x256xf32> to vector<8x256xf32>
    %70 = arith.addf %67, %69 : vector<8x256xf32>
    %cst_25 = arith.constant 0.000000e+00 : f32
    %71 = vector.broadcast %cst_25 : f32 to vector<8x256xf32>
    %72 = arith.maximumf %70, %71 : vector<8x256xf32>
    %73 = arith.truncf %72 : vector<8x256xf32> to vector<8x256xbf16>
    %c5 = arith.constant 5 : index
    %c0_26 = arith.constant 0 : index
    %c0_27 = arith.constant 0 : index
    %74 = vector.load %arg2[%c5, %c0_26, %c0_27] : memref<6x256x256xbf16, #tpu.memory_space<vmem>>, vector<1x256x256xbf16>
    %75 = vector.shape_cast %74 : vector<1x256x256xbf16> to vector<256x256xbf16>
    %cst_28 = arith.constant dense<0.000000e+00> : vector<8x256xf32>
    %76 = tpu.matmul %73, %75, %cst_28 {dimension_numbers = #tpu.dot_dimension_numbers<[1], [0], [0], [1], [0, 0, 1, 1], [], []>} : vector<8x256xbf16>, vector<256x256xbf16>, vector<8x256xf32> -> vector<8x256xf32>
    %77 = vector.extract_strided_slice %1 {offsets = [5, 0], sizes = [1, 256], strides = [1, 1]} : vector<8x256xf32> to vector<1x256xf32>
    %78 = vector.broadcast %77 : vector<1x256xf32> to vector<8x256xf32>
    %79 = arith.addf %76, %78 : vector<8x256xf32>
    %80 = arith.negf %79 : vector<8x256xf32>
    %81 = math.exp %80 : vector<8x256xf32>
    %cst_29 = arith.constant 1.000000e+00 : f32
    %82 = vector.broadcast %cst_29 : f32 to vector<8x256xf32>
    %83 = arith.addf %82, %81 : vector<8x256xf32>
    %84 = arith.divf %82, %83 : vector<8x256xf32>
    %c0_30 = arith.constant 0 : index
    %c0_31 = arith.constant 0 : index
    %85 = vector.load %arg4[%c0_30, %c0_31] : memref<8x256xf32, #tpu.memory_space<vmem>>, vector<8x256xf32>
    tpu.vector_store %arg4[%c0_30, %c0_31], %84 {strides = array<i32>} : memref<8x256xf32, #tpu.memory_space<vmem>>, vector<8x256xf32>,
    return
  }
  func.func @transform_0(%arg0: i32) -> (i32, i32) {
    %c0_i32 = arith.constant 0 : i32
    %c0_i32_0 = arith.constant 0 : i32
    return %arg0, %c0_i32 : i32, i32
  }
  func.func @transform_1(%arg0: i32) -> (i32, i32, i32) {
    %c0_i32 = arith.constant 0 : i32
    %c0_i32_0 = arith.constant 0 : i32
    %c0_i32_1 = arith.constant 0 : i32
    %c0_i32_2 = arith.constant 0 : i32
    return %c0_i32, %c0_i32_0, %c0_i32_1 : i32, i32, i32
  }
  func.func @transform_2(%arg0: i32) -> (i32, i32) {
    %c0_i32 = arith.constant 0 : i32
    %c0_i32_0 = arith.constant 0 : i32
    %c0_i32_1 = arith.constant 0 : i32
    return %c0_i32, %c0_i32_0 : i32, i32
  }
  func.func @transform_3(%arg0: i32) -> (i32, i32) {
    %c0_i32 = arith.constant 0 : i32
    %c0_i32_0 = arith.constant 0 : i32
    return %arg0, %c0_i32 : i32, i32
  }
  func.func @transform_4(%arg0: i32) -> (i32, i32) {
    %c0_i32 = arith.constant 0 : i32
    %c0_i32_0 = arith.constant 0 : i32
    return %arg0, %c0_i32 : i32, i32
  }
}

</mosaic_0001>

<bundles_post_ra>
// kernel: tile.41
= control target key start
LH: loop header
LB: loop body
LE: loop exit
PB: predicated region body
PF: predicated region fallthrough
CT: control target
= control target key end

     0   :  { %s28_s0 = inlined_call_operand.vmem [shape: f32[16], index: 0, kind: input, shape index: {}]   ;;  %s29_s1 = inlined_call_operand.vmem [shape: f32[16,16], index: 1, kind: output, shape index: {}]  }
   0x1   :  { %v4_v0 = vld [vmem:[%s28_s0] ss:$0 sm:$0xff] }
   0x2   :  { %5 = vst [vmem:[%s29_s1] sm:$0xff] %v4_v0 }
   0x3   :  { %8 = vst [vmem:[%s29_s1 + $0x8] sm:$0xff] %v4_v0 }

// kernel: tile.56
= control target key start
LH: loop header
LB: loop body
LE: loop exit
PB: predicated region body
PF: predicated region fallthrough
CT: control target
= control target key end

     0   :  { %s7_s6 = smov 3  ;;  %s21_s9 = smov 3  ;;  %vm4_vm0 = vcmask 130048   ;;  %vm11_vm1 = vcmask 1048448   ;;  %vm18_vm2 = vcmask 917248   ;;  %vm25_vm3 = vcmask 786048   ;;  %s129_s0 = inlined_call_operand.vmem [shape: f32[16,16], index: 0, kind: input, shape index: {}]   ;;  %s130_s1 = inlined_call_operand.vmem [shape: f32[1,256], index: 1, kind: output, shape index: {}]  }
   0x1   :  { %v67_v0 = vld [vmem:[%s129_s0 + $0x7] ss:$8 sm:%s7_s6]   ;;  %s82_s10 = smov 112   ;;  %v69_v1 = vld [vmem:[%s129_s0 + $0x5] ss:$8 sm:%s21_s9]   ;;  %s83_s13 = smov 80  }
   0x2   :  { %9 = vrot.lane.b32.xlu0 %v67_v0, %s82_s10  ;;  %23 = vrot.lane.b32.xlu1 %v69_v1, %s83_s13  ;;  %s14_s14 = smov 3  ;;  %s28_s15 = smov 3  ;;  %vm32_vm4 = vcmask 654848   ;;  %vm39_vm5 = vcmask 523648   ;;  %vm46_vm6 = vcmask 392448   ;;  %vm53_vm7 = vcmask 261248  }
   0x3   :  { %s35_s16 = smov 3  ;;  %v68_v3 = vld [vmem:[%s129_s0 + $0x6] ss:$8 sm:%s14_s14]   ;;  %s84_s21 = smov 48   ;;  %v70_v4 = vld [vmem:[%s129_s0 + $0x4] ss:$8 sm:%s28_s15]  }
   0x4   :  { %v71_v2 = vld [vmem:[%s129_s0 + $0x3] ss:$8 sm:%s35_s16]   ;;  %s42_s24 = smov 3  ;;  %s85_s25 = smov 96  }
   0x5   :  { %37 = vrot.lane.b32.xlu2 %v71_v2, %s84_s21  ;;  %s86_s26 = smov 64   ;;  %s49_s27 = smov 3  ;;  %v72_v5 = vld [vmem:[%s129_s0 + $0x2] ss:$8 sm:%s42_s24]  }
   0x6   :  { %v73_v6 = vld [vmem:[%s129_s0 + $0x1] ss:$8 sm:%s49_s27]   ;;  %s87_s3 = smov 32   ;;  %s88_s4 = smov 16  }
   0x7   :  { %s2_s5 = smov 3 }
   0x8   :  { %v3_v7 = vld [vmem:[%s129_s0] ss:$8 sm:%s2_s5]  }
   0x9   :  { %5 = vst.msk [vmem:[#allocation0] ss:$8 sm:$0x3] %vm4_vm0, %v3_v7  }
   0xa   :  { %16 = vrot.lane.b32.xlu0 %v68_v3, %s85_s25  ;;  %30 = vrot.lane.b32.xlu1 %v70_v4, %s86_s26 }
   0xd   :  { %44 = vrot.lane.b32.xlu2 %v72_v5, %s87_s3 }
  0x12   :  { %51 = vrot.lane.b32.xlu0 %v73_v6, %s88_s4 }
  0x5f   :  { %v38_v8 = vpop.permute.xlu2 %37  }
  0x67   :  { %v45_v9 = vpop.permute.xlu2 %44  }
  0x74   :  { %v10_v10 = vpop.permute.xlu0 %9   ;;  %v24_v11 = vpop.permute.xlu1 %23  }
  0x75   :  { %12 = vst.msk [vmem:[#allocation0] ss:$8 sm:$0x3] %vm11_vm1, %v10_v10  }
  0x7c   :  { %v17_v12 = vpop.permute.xlu0 %16   ;;  %v31_v13 = vpop.permute.xlu1 %30  }
  0x7d   :  { %19 = vst.msk [vmem:[#allocation0] ss:$8 sm:$0x3] %vm18_vm2, %v17_v12  }
  0x7e   :  { %26 = vst.msk [vmem:[#allocation0] ss:$8 sm:$0x3] %vm25_vm3, %v24_v11  }
  0x7f   :  { %33 = vst.msk [vmem:[#allocation0] ss:$8 sm:$0x3] %vm32_vm4, %v31_v13  }
  0x80   :  { %40 = vst.msk [vmem:[#allocation0] ss:$8 sm:$0x3] %vm39_vm5, %v38_v8  }
  0x81   :  { %47 = vst.msk [vmem:[#allocation0] ss:$8 sm:$0x3] %vm46_vm6, %v45_v9  }
  0x84   :  { %v52_v14 = vpop.permute.xlu0 %51  }
  0x85   :  { %54 = vst.msk [vmem:[#allocation0] ss:$8 sm:$0x3] %vm53_vm7, %v52_v14  }
  0x8c   :  { %v57_v15 = vld [vmem:[#allocation0] sm:$0x1]  ;;  %v62_v16 = vld [vmem:[#allocation0 + $0x8] sm:$0x1] }
  0x8d   :  { %60 = vst [vmem:[%s130_s1] sm:$0x1] %v57_v15 }
  0x8e   :  { %74 = vst [vmem:[%s130_s1 + $0x1] sm:$0x1] %v62_v16 }

// kernel: vae_forward.1
= control target key start
LH: loop header
LB: loop body
LE: loop exit
PB: predicated region body
PF: predicated region fallthrough
CT: control target
= control target key end

     0   :  { %s4081_s1 = inlined_call_operand.vmem [shape: bf16[6,256,256], index: 1, kind: input, shape index: {}]   ;;  %s4082_s0 = inlined_call_operand.vmem [shape: f32[8,256], index: 0, kind: input, shape index: {}]   ;;  %s4083_s2 = inlined_call_operand.vmem [shape: f32[8,256], index: 2, kind: input, shape index: {}]   ;;  %s4084_s4 = inlined_call_operand.vmem [shape: f32[8,256], index: 4, kind: output, shape index: {1}]   ;;  %s4085_s3 = inlined_call_operand.vmem [shape: f32[8,256], index: 3, kind: output, shape index: {0}]  }
   0x1   :  { %v1706_v0 = vld [vmem:[%s4081_s1 + $0x70] sm:$0xf]  ;;  %v2593_v1 = vld [vmem:[%s4081_s1 + $0x74] sm:$0xf0]  ;;  %v2592_v5 = vld [vmem:[%s4081_s1 + $0x74] sm:$0xf] }
   0x2   :  { %v1770_v2 = vld [vmem:[%s4081_s1 + $0xf0] sm:$0xf]  ;;  %v1707_v3 = vor.u32 %v2593_v1, %v1706_v0  ;;  %v2609_v4 = vld [vmem:[%s4081_s1 + $0xf4] sm:$0xf0]  ;;  %v1708_v6 = vld [vmem:[%s4081_s1 + $0x78] sm:$0xf0] }
   0x3   :  { %v1771_v7 = vor.u32 %v2609_v4, %v1770_v2  ;;  %v1711_v8 = vor.u32 %v2592_v5, %v1708_v6  ;;  %v2608_v9 = vld [vmem:[%s4081_s1 + $0xf4] sm:$0xf]  ;;  %v1772_v10 = vld [vmem:[%s4081_s1 + $0xf8] sm:$0xf0]  ;;  %v1698_v11 = vld [vmem:[%s4081_s1 + $0x60] sm:$0xf] }
   0x4   :  { %223 = vmatpush.bf16.msra.mxu0 %v1707_v3  ;;  %v1775_v12 = vor.u32 %v2608_v9, %v1772_v10  ;;  %v2591_v13 = vld [vmem:[%s4081_s1 + $0x64] sm:$0xf0]  ;;  %v1762_v14 = vld [vmem:[%s4081_s1 + $0xe0] sm:$0xf]  ;;  %v2590_v18 = vld [vmem:[%s4081_s1 + $0x64] sm:$0xf] }
   0x5   :  { %v2607_v15 = vld [vmem:[%s4081_s1 + $0xe4] sm:$0xf0]  ;;  %236 = vmatpush.bf16.msra.mxu1 %v1771_v7  ;;  %249 = vmatpush.bf16.msra.mxu2 %v1711_v8  ;;  %v1699_v16 = vor.u32 %v2591_v13, %v1698_v11  ;;  %v1700_v19 = vld [vmem:[%s4081_s1 + $0x68] sm:$0xf0]  ;;  %v2606_v20 = vld [vmem:[%s4081_s1 + $0xe4] sm:$0xf] }
   0x6   :  { %v1763_v17 = vor.u32 %v2607_v15, %v1762_v14  ;;  %262 = vmatpush.bf16.msra.mxu3 %v1775_v12  ;;  %v1703_v21 = vor.u32 %v2590_v18, %v1700_v19  ;;  %v1764_v22 = vld [vmem:[%s4081_s1 + $0xe8] sm:$0xf0]  ;;  %v1690_v23 = vld [vmem:[%s4081_s1 + $0x50] sm:$0xf]  ;;  %v2589_v24 = vld [vmem:[%s4081_s1 + $0x54] sm:$0xf0] }
   0x7   :  { %v1767_v25 = vor.u32 %v2606_v20, %v1764_v22  ;;  %v1754_v26 = vld [vmem:[%s4081_s1 + $0xd0] sm:$0xf]  ;;  %v2605_v27 = vld [vmem:[%s4081_s1 + $0xd4] sm:$0xf0]  ;;  %v2588_v28 = vld [vmem:[%s4081_s1 + $0x54] sm:$0xf]  ;;  %v1691_v29 = vor.u32 %v2589_v24, %v1690_v23 }
   0x8   :  { %224 = vmatpush.bf16.msra.mxu0 %v1699_v16  ;;  %v1692_v30 = vld [vmem:[%s4081_s1 + $0x58] sm:$0xf0]  ;;  %v2604_v31 = vld [vmem:[%s4081_s1 + $0xd4] sm:$0xf]  ;;  %v1755_v33 = vor.u32 %v2605_v27, %v1754_v26  ;;  %v1682_v35 = vld [vmem:[%s4081_s1 + $0x40] sm:$0xf] }
   0x9   :  { %v1756_v32 = vld [vmem:[%s4081_s1 + $0xd8] sm:$0xf0]  ;;  %237 = vmatpush.bf16.msra.mxu1 %v1763_v17  ;;  %250 = vmatpush.bf16.msra.mxu2 %v1703_v21  ;;  %v1695_v34 = vor.u32 %v2588_v28, %v1692_v30  ;;  %v2587_v36 = vld [vmem:[%s4081_s1 + $0x44] sm:$0xf0]  ;;  %v1746_v37 = vld [vmem:[%s4081_s1 + $0xc0] sm:$0xf] }
   0xa   :  { %263 = vmatpush.bf16.msra.mxu3 %v1767_v25  ;;  %v1759_v38 = vor.u32 %v2604_v31, %v1756_v32  ;;  %v2603_v39 = vld [vmem:[%s4081_s1 + $0xc4] sm:$0xf0]  ;;  %v2586_v40 = vld [vmem:[%s4081_s1 + $0x44] sm:$0xf]  ;;  %v1684_v41 = vld [vmem:[%s4081_s1 + $0x48] sm:$0xf0]  ;;  %v1683_v44 = vor.u32 %v2587_v36, %v1682_v35 }
   0xb   :  { %v2602_v42 = vld [vmem:[%s4081_s1 + $0xc4] sm:$0xf]  ;;  %v1748_v43 = vld [vmem:[%s4081_s1 + $0xc8] sm:$0xf0]  ;;  %v1747_v45 = vor.u32 %v2603_v39, %v1746_v37  ;;  %v1687_v46 = vor.u32 %v2586_v40, %v1684_v41  ;;  %v1674_v47 = vld [vmem:[%s4081_s1 + $0x30] sm:$0xf] }
   0xc   :  { %225 = vmatpush.bf16.msra.mxu0 %v1691_v29  ;;  %v2585_v48 = vld [vmem:[%s4081_s1 + $0x34] sm:$0xf0]  ;;  %v1738_v49 = vld [vmem:[%s4081_s1 + $0xb0] sm:$0xf]  ;;  %v1751_v50 = vor.u32 %v2602_v42, %v1748_v43  ;;  %v2584_v52 = vld [vmem:[%s4081_s1 + $0x34] sm:$0xf] }
   0xd   :  { %238 = vmatpush.bf16.msra.mxu1 %v1755_v33  ;;  %251 = vmatpush.bf16.msra.mxu2 %v1695_v34  ;;  %v2601_v51 = vld [vmem:[%s4081_s1 + $0xb4] sm:$0xf0]  ;;  %v1676_v53 = vld [vmem:[%s4081_s1 + $0x38] sm:$0xf0]  ;;  %v2600_v54 = vld [vmem:[%s4081_s1 + $0xb4] sm:$0xf]  ;;  %v1675_v56 = vor.u32 %v2585_v48, %v1674_v47 }
   0xe   :  { %264 = vmatpush.bf16.msra.mxu3 %v1759_v38  ;;  %v1740_v55 = vld [vmem:[%s4081_s1 + $0xb8] sm:$0xf0]  ;;  %v1739_v57 = vor.u32 %v2601_v51, %v1738_v49  ;;  %v1679_v58 = vor.u32 %v2584_v52, %v1676_v53  ;;  %v1666_v59 = vld [vmem:[%s4081_s1 + $0x20] sm:$0xf]  ;;  %v2583_v60 = vld [vmem:[%s4081_s1 + $0x24] sm:$0xf0] }
   0xf   :  { %v1730_v61 = vld [vmem:[%s4081_s1 + $0xa0] sm:$0xf]  ;;  %v1743_v62 = vor.u32 %v2600_v54, %v1740_v55  ;;  %v2599_v63 = vld [vmem:[%s4081_s1 + $0xa4] sm:$0xf0]  ;;  %v2582_v0 = vld [vmem:[%s4081_s1 + $0x24] sm:$0xf]  ;;  %v1667_v4 = vor.u32 %v2583_v60, %v1666_v59 }
  0x10   :  { %226 = vmatpush.bf16.msra.mxu0 %v1683_v44  ;;  %v1668_v1 = vld [vmem:[%s4081_s1 + $0x28] sm:$0xf0]  ;;  %v2598_v2 = vld [vmem:[%s4081_s1 + $0xa4] sm:$0xf]  ;;  %v1731_v5 = vor.u32 %v2599_v63, %v1730_v61  ;;  %v1658_v7 = vld [vmem:[%s4081_s1 + $0x10] sm:$0xf] }
  0x11   :  { %239 = vmatpush.bf16.msra.mxu1 %v1747_v45  ;;  %252 = vmatpush.bf16.msra.mxu2 %v1687_v46  ;;  %v1732_v3 = vld [vmem:[%s4081_s1 + $0xa8] sm:$0xf0]  ;;  %v1671_v6 = vor.u32 %v2582_v0, %v1668_v1  ;;  %v2581_v8 = vld [vmem:[%s4081_s1 + $0x14] sm:$0xf0]  ;;  %v1722_v9 = vld [vmem:[%s4081_s1 + $0x90] sm:$0xf] }
  0x12   :  { %265 = vmatpush.bf16.msra.mxu3 %v1751_v50  ;;  %v1735_v10 = vor.u32 %v2598_v2, %v1732_v3  ;;  %v2597_v11 = vld [vmem:[%s4081_s1 + $0x94] sm:$0xf0]  ;;  %v2580_v12 = vld [vmem:[%s4081_s1 + $0x14] sm:$0xf]  ;;  %v1660_v13 = vld [vmem:[%s4081_s1 + $0x18] sm:$0xf0]  ;;  %v1659_v16 = vor.u32 %v2581_v8, %v1658_v7 }
  0x13   :  { %v2596_v14 = vld [vmem:[%s4081_s1 + $0x94] sm:$0xf]  ;;  %v1724_v15 = vld [vmem:[%s4081_s1 + $0x98] sm:$0xf0]  ;;  %v1650_v17 = vld [vmem:[%s4081_s1] sm:$0xf]  ;;  %v1723_v18 = vor.u32 %v2597_v11, %v1722_v9  ;;  %v1663_v19 = vor.u32 %v2580_v12, %v1660_v13 }
  0x14   :  { %227 = vmatpush.bf16.msra.mxu0 %v1675_v56  ;;  %v2579_v20 = vld [vmem:[%s4081_s1 + $0x4] sm:$0xf0]  ;;  %v1714_v21 = vld [vmem:[%s4081_s1 + $0x80] sm:$0xf]  ;;  %v1727_v23 = vor.u32 %v2596_v14, %v1724_v15  ;;  %v2578_v24 = vld [vmem:[%s4081_s1 + $0x4] sm:$0xf] }
  0x15   :  { %240 = vmatpush.bf16.msra.mxu1 %v1739_v57  ;;  %253 = vmatpush.bf16.msra.mxu2 %v1679_v58  ;;  %v2595_v22 = vld [vmem:[%s4081_s1 + $0x84] sm:$0xf0]  ;;  %v1652_v25 = vld [vmem:[%s4081_s1 + $0x8] sm:$0xf0]  ;;  %v2594_v26 = vld [vmem:[%s4081_s1 + $0x84] sm:$0xf]  ;;  %v1651_v30 = vor.u32 %v2579_v20, %v1650_v17 }
  0x16   :  { %266 = vmatpush.bf16.msra.mxu3 %v1743_v62  ;;  %v1716_v27 = vld [vmem:[%s4081_s1 + $0x88] sm:$0xf0]  ;;  %v1866_v28 = vld [vmem:[%s4081_s1 + $0x170] sm:$0xf]  ;;  %v2625_v29 = vld [vmem:[%s4081_s1 + $0x174] sm:$0xf0]  ;;  %v1715_v34 = vor.u32 %v2595_v22, %v1714_v21  ;;  %v1655_v35 = vor.u32 %v2578_v24, %v1652_v25 }
  0x17   :  { %v16_v31 = vld [vmem:[%s4082_s0] sm:$0xff]  ;;  %v2624_v32 = vld [vmem:[%s4081_s1 + $0x174] sm:$0xf]  ;;  %v1868_v33 = vld [vmem:[%s4081_s1 + $0x178] sm:$0xf0]  ;;  %v1719_v37 = vor.u32 %v2594_v26, %v1716_v27  ;;  %v1867_v38 = vor.u32 %v2625_v29, %v1866_v28 }
  0x18   :  { %228 = vmatpush.bf16.msra.mxu0 %v1667_v4  ;;  %v17_v36 = vld [vmem:[%s4082_s0 + $0x8] sm:$0xff]  ;;  %v1858_v39 = vld [vmem:[%s4081_s1 + $0x160] sm:$0xf]  ;;  %v1930_v40 = vld [vmem:[%s4081_s1 + $0x1f0] sm:$0xf]  ;;  %v27_v42 = vpack.c.bf16 %v16_v31, %v16_v31  ;;  %v1871_v43 = vor.u32 %v2624_v32, %v1868_v33 }
  0x19   :  { %241 = vmatpush.bf16.msra.mxu1 %v1731_v5  ;;  %254 = vmatpush.bf16.msra.mxu2 %v1671_v6  ;;  %v2641_v41 = vld [vmem:[%s4081_s1 + $0x1f4] sm:$0xf0]  ;;  %v2623_v44 = vld [vmem:[%s4081_s1 + $0x164] sm:$0xf0]  ;;  %v2640_v45 = vld [vmem:[%s4081_s1 + $0x1f4] sm:$0xf]  ;;  %v28_v47 = vpack.c.bf16 %v17_v36, %v17_v36 }
  0x1a   :  { %267 = vmatpush.bf16.msra.mxu3 %v1735_v10  ;;  %v1932_v46 = vld [vmem:[%s4081_s1 + $0x1f8] sm:$0xf0]  ;;  %v2622_v48 = vld [vmem:[%s4081_s1 + $0x164] sm:$0xf]  ;;  %v1860_v49 = vld [vmem:[%s4081_s1 + $0x168] sm:$0xf0]  ;;  %v1931_v50 = vor.u32 %v2641_v41, %v1930_v40  ;;  %v1859_v51 = vor.u32 %v2623_v44, %v1858_v39 }
  0x1b   :  { %v1935_v52 = vor.u32 %v2640_v45, %v1932_v46  ;;  %v1850_v53 = vld [vmem:[%s4081_s1 + $0x150] sm:$0xf]  ;;  %v1922_v54 = vld [vmem:[%s4081_s1 + $0x1e0] sm:$0xf]  ;;  %v2639_v55 = vld [vmem:[%s4081_s1 + $0x1e4] sm:$0xf0]  ;;  %v1863_v56 = vor.u32 %v2622_v48, %v1860_v49 }
  0x1c   :  { %229 = vmatpush.bf16.msra.mxu0 %v1659_v16  ;;  %v2621_v57 = vld [vmem:[%s4081_s1 + $0x154] sm:$0xf0]  ;;  %v2638_v58 = vld [vmem:[%s4081_s1 + $0x1e4] sm:$0xf]  ;;  %v1924_v59 = vld [vmem:[%s4081_s1 + $0x1e8] sm:$0xf0]  ;;  %v1923_v62 = vor.u32 %v2639_v55, %v1922_v54 }
  0x1d   :  { %242 = vmatpush.bf16.msra.mxu1 %v1723_v18  ;;  %255 = vmatpush.bf16.msra.mxu2 %v1663_v19  ;;  %v2620_v60 = vld [vmem:[%s4081_s1 + $0x154] sm:$0xf]  ;;  %v1852_v61 = vld [vmem:[%s4081_s1 + $0x158] sm:$0xf0]  ;;  %v1851_v63 = vor.u32 %v2621_v57, %v1850_v53  ;;  %v1927_v0 = vor.u32 %v2638_v58, %v1924_v59  ;;  %v1842_v1 = vld [vmem:[%s4081_s1 + $0x140] sm:$0xf] }
  0x1e   :  { %268 = vmatpush.bf16.msra.mxu3 %v1727_v23  ;;  %v1914_v2 = vld [vmem:[%s4081_s1 + $0x1d0] sm:$0xf]  ;;  %v2637_v3 = vld [vmem:[%s4081_s1 + $0x1d4] sm:$0xf0]  ;;  %v1855_v4 = vor.u32 %v2620_v60, %v1852_v61  ;;  %v2619_v5 = vld [vmem:[%s4081_s1 + $0x144] sm:$0xf0] }
  0x1f   :  { %v2636_v6 = vld [vmem:[%s4081_s1 + $0x1d4] sm:$0xf]  ;;  %v1916_v7 = vld [vmem:[%s4081_s1 + $0x1d8] sm:$0xf0]  ;;  %v2618_v8 = vld [vmem:[%s4081_s1 + $0x144] sm:$0xf]  ;;  %v1915_v10 = vor.u32 %v2637_v3, %v1914_v2  ;;  %v1843_v11 = vor.u32 %v2619_v5, %v1842_v1 }
  0x20   :  { %230 = vmatpush.bf16.msra.mxu0 %v1651_v30  ;;  %v1844_v9 = vld [vmem:[%s4081_s1 + $0x148] sm:$0xf0]  ;;  %v1919_v12 = vor.u32 %v2636_v6, %v1916_v7  ;;  %v1834_v13 = vld [vmem:[%s4081_s1 + $0x130] sm:$0xf]  ;;  %v1906_v14 = vld [vmem:[%s4081_s1 + $0x1c0] sm:$0xf] }
  0x21   :  { %243 = vmatpush.bf16.msra.mxu1 %v1715_v34  ;;  %256 = vmatpush.bf16.msra.mxu2 %v1655_v35  ;;  %v2635_v15 = vld [vmem:[%s4081_s1 + $0x1c4] sm:$0xf0]  ;;  %v1847_v16 = vor.u32 %v2618_v8, %v1844_v9  ;;  %v2617_v17 = vld [vmem:[%s4081_s1 + $0x134] sm:$0xf0]  ;;  %v2634_v18 = vld [vmem:[%s4081_s1 + $0x1c4] sm:$0xf] }
  0x22   :  { %269 = vmatpush.bf16.msra.mxu3 %v1719_v37  ;;  %v1908_v19 = vld [vmem:[%s4081_s1 + $0x1c8] sm:$0xf0]  ;;  %v2616_v20 = vld [vmem:[%s4081_s1 + $0x134] sm:$0xf]  ;;  %v1836_v21 = vld [vmem:[%s4081_s1 + $0x138] sm:$0xf0]  ;;  %v1907_v22 = vor.u32 %v2635_v15, %v1906_v14  ;;  %v1835_v23 = vor.u32 %v2617_v17, %v1834_v13 }
  0x23   :  { %231 = vmatmul.bf16.vlgmr.msra.gmra.mxu0 %v27_v42  ;;  %v1911_v24 = vor.u32 %v2634_v18, %v1908_v19  ;;  %v1839_v25 = vor.u32 %v2616_v20, %v1836_v21  ;;  %v1826_v26 = vld [vmem:[%s4081_s1 + $0x120] sm:$0xf]  ;;  %v2615_v27 = vld [vmem:[%s4081_s1 + $0x124] sm:$0xf0]  ;;  %v2614_v28 = vld [vmem:[%s4081_s1 + $0x124] sm:$0xf] }
  0x24   :  { %474 = vmatpush.bf16.msrb.mxu0 %v1867_v38  ;;  %244 = vmatmul.bf16.vlgmr.msra.gmra.mxu1 %v28_v47  ;;  %v1828_v29 = vld [vmem:[%s4081_s1 + $0x128] sm:$0xf0]  ;;  %v1827_v30 = vor.u32 %v2615_v27, %v1826_v26  ;;  %v1898_v32 = vld [vmem:[%s4081_s1 + $0x1b0] sm:$0xf]  ;;  %v2633_v33 = vld [vmem:[%s4081_s1 + $0x1b4] sm:$0xf0] }
  0x25   :  { %500 = vmatpush.bf16.msrb.mxu2 %v1871_v43  ;;  %270 = vmatmul.bf16.vlgmr.msra.gmra.mxu3 %v28_v47  ;;  %v1831_v31 = vor.u32 %v2614_v28, %v1828_v29  ;;  %v2632_v34 = vld [vmem:[%s4081_s1 + $0x1b4] sm:$0xf]  ;;  %v1899_v35 = vor.u32 %v2633_v33, %v1898_v32  ;;  %v1900_v36 = vld [vmem:[%s4081_s1 + $0x1b8] sm:$0xf0]  ;;  %v1818_v38 = vld [vmem:[%s4081_s1 + $0x110] sm:$0xf] }
  0x26   :  { %257 = vmatmul.bf16.vlgmr.msra.gmra.mxu2 %v27_v42  ;;  %487 = vmatpush.bf16.msrb.mxu1 %v1931_v50  ;;  %v1903_v37 = vor.u32 %v2632_v34, %v1900_v36  ;;  %v2613_v39 = vld [vmem:[%s4081_s1 + $0x114] sm:$0xf0]  ;;  %v2612_v40 = vld [vmem:[%s4081_s1 + $0x114] sm:$0xf]  ;;  %v1820_v42 = vld [vmem:[%s4081_s1 + $0x118] sm:$0xf0] }
  0x27   :  { %513 = vmatpush.bf16.msrb.mxu3 %v1935_v52  ;;  %v1819_v41 = vor.u32 %v2613_v39, %v1818_v38  ;;  %v1823_v43 = vor.u32 %v2612_v40, %v1820_v42  ;;  %v1890_v44 = vld [vmem:[%s4081_s1 + $0x1a0] sm:$0xf]  ;;  %v2631_v45 = vld [vmem:[%s4081_s1 + $0x1a4] sm:$0xf0]  ;;  %v2630_v46 = vld [vmem:[%s4081_s1 + $0x1a4] sm:$0xf] }
  0x28   :  { %475 = vmatpush.bf16.msrb.mxu0 %v1859_v51  ;;  %v1891_v47 = vor.u32 %v2631_v45, %v1890_v44  ;;  %v1892_v48 = vld [vmem:[%s4081_s1 + $0x1a8] sm:$0xf0]  ;;  %v1810_v50 = vld [vmem:[%s4081_s1 + $0x100] sm:$0xf]  ;;  %v2611_v51 = vld [vmem:[%s4081_s1 + $0x104] sm:$0xf0] }
  0x29   :  { %501 = vmatpush.bf16.msrb.mxu2 %v1863_v56  ;;  %v1895_v49 = vor.u32 %v2630_v46, %v1892_v48  ;;  %v2610_v52 = vld [vmem:[%s4081_s1 + $0x104] sm:$0xf]  ;;  %v1811_v53 = vor.u32 %v2611_v51, %v1810_v50  ;;  %v1812_v54 = vld [vmem:[%s4081_s1 + $0x108] sm:$0xf0]  ;;  %v1882_v56 = vld [vmem:[%s4081_s1 + $0x190] sm:$0xf] }
  0x2a   :  { %488 = vmatpush.bf16.msrb.mxu1 %v1923_v62  ;;  %v1815_v55 = vor.u32 %v2610_v52, %v1812_v54  ;;  %v2629_v57 = vld [vmem:[%s4081_s1 + $0x194] sm:$0xf0]  ;;  %v2628_v59 = vld [vmem:[%s4081_s1 + $0x194] sm:$0xf]  ;;  %v1884_v60 = vld [vmem:[%s4081_s1 + $0x198] sm:$0xf0] }
  0x2b   :  { %514 = vmatpush.bf16.msrb.mxu3 %v1927_v0  ;;  %v1883_v58 = vor.u32 %v2629_v57, %v1882_v56  ;;  %v1887_v61 = vor.u32 %v2628_v59, %v1884_v60  ;;  %v1874_v62 = vld [vmem:[%s4081_s1 + $0x180] sm:$0xf]  ;;  %v2626_v0 = vld [vmem:[%s4081_s1 + $0x184] sm:$0xf]  ;;  %v1876_v2 = vld [vmem:[%s4081_s1 + $0x188] sm:$0xf0] }
  0x2c   :  { %476 = vmatpush.bf16.msrb.mxu0 %v1851_v63  ;;  %v2627_v63 = vld [vmem:[%s4081_s1 + $0x184] sm:$0xf0]  ;;  %v1879_v3 = vor.u32 %v2626_v0, %v1876_v2  ;;  %v2657_v5 = vld [vmem:[%s4081_s1 + $0x274] sm:$0xf0]  ;;  %v2656_v6 = vld [vmem:[%s4081_s1 + $0x274] sm:$0xf] }
  0x2d   :  { %502 = vmatpush.bf16.msrb.mxu2 %v1855_v4  ;;  %v1875_v1 = vor.u32 %v2627_v63, %v1874_v62  ;;  %v2026_v4 = vld [vmem:[%s4081_s1 + $0x270] sm:$0xf]  ;;  %v2028_v8 = vld [vmem:[%s4081_s1 + $0x278] sm:$0xf0]  ;;  %v2018_v9 = vld [vmem:[%s4081_s1 + $0x260] sm:$0xf] }
  0x2e   :  { %489 = vmatpush.bf16.msrb.mxu1 %v1915_v10  ;;  %v2027_v7 = vor.u32 %v2657_v5, %v2026_v4  ;;  %v2655_v10 = vld [vmem:[%s4081_s1 + $0x264] sm:$0xf0]  ;;  %v2020_v13 = vld [vmem:[%s4081_s1 + $0x268] sm:$0xf0]  ;;  %v2090_v14 = vld [vmem:[%s4081_s1 + $0x2f0] sm:$0xf] }
  0x2f   :  { %515 = vmatpush.bf16.msrb.mxu3 %v1919_v12  ;;  %v2654_v12 = vld [vmem:[%s4081_s1 + $0x264] sm:$0xf]  ;;  %v2019_v15 = vor.u32 %v2655_v10, %v2018_v9  ;;  %v2672_v17 = vld [vmem:[%s4081_s1 + $0x2f4] sm:$0xf]  ;;  %v2092_v18 = vld [vmem:[%s4081_s1 + $0x2f8] sm:$0xf0] }
  0x30   :  { %477 = vmatpush.bf16.msrb.mxu0 %v1843_v11  ;;  %v2031_v11 = vor.u32 %v2656_v6, %v2028_v8  ;;  %v2023_v19 = vor.u32 %v2654_v12, %v2020_v13  ;;  %v2095_v21 = vor.u32 %v2672_v17, %v2092_v18  ;;  %v2082_v26 = vld [vmem:[%s4081_s1 + $0x2e0] sm:$0xf]  ;;  %v2671_v27 = vld [vmem:[%s4081_s1 + $0x2e4] sm:$0xf0]  ;;  %v2670_v29 = vld [vmem:[%s4081_s1 + $0x2e4] sm:$0xf] }
  0x31   :  { %503 = vmatpush.bf16.msrb.mxu2 %v1847_v16  ;;  %v2673_v16 = vld [vmem:[%s4081_s1 + $0x2f4] sm:$0xf0]  ;;  %v2083_v28 = vor.u32 %v2671_v27, %v2082_v26  ;;  %v2002_v33 = vld [vmem:[%s4081_s1 + $0x240] sm:$0xf]  ;;  %v2651_v34 = vld [vmem:[%s4081_s1 + $0x244] sm:$0xf0] }
  0x32   :  { %490 = vmatpush.bf16.msrb.mxu1 %v1907_v22  ;;  %v2091_v20 = vor.u32 %v2673_v16, %v2090_v14  ;;  %v2010_v22 = vld [vmem:[%s4081_s1 + $0x250] sm:$0xf]  ;;  %v2668_v38 = vld [vmem:[%s4081_s1 + $0x2d4] sm:$0xf]  ;;  %v2650_v39 = vld [vmem:[%s4081_s1 + $0x244] sm:$0xf]  ;;  %v2003_v45 = vor.u32 %v2651_v34, %v2002_v33 }
  0x33   :  { %516 = vmatpush.bf16.msrb.mxu3 %v1911_v24  ;;  %v2652_v24 = vld [vmem:[%s4081_s1 + $0x254] sm:$0xf]  ;;  %v2074_v36 = vld [vmem:[%s4081_s1 + $0x2d0] sm:$0xf]  ;;  %v2004_v40 = vld [vmem:[%s4081_s1 + $0x248] sm:$0xf0] }
  0x34   :  { %478 = vmatpush.bf16.msrb.mxu0 %v1835_v23  ;;  %v2653_v23 = vld [vmem:[%s4081_s1 + $0x254] sm:$0xf0]  ;;  %v3296_v42 = vld [vmem:[%s4083_s2] sm:$0xff]  ;;  %v2007_v46 = vor.u32 %v2650_v39, %v2004_v40  ;;  %v2648_v50 = vld [vmem:[%s4081_s1 + $0x234] sm:$0xf] }
  0x35   :  { %504 = vmatpush.bf16.msrb.mxu2 %v1839_v25  ;;  %v2012_v25 = vld [vmem:[%s4081_s1 + $0x258] sm:$0xf0]  ;;  %v2649_v48 = vld [vmem:[%s4081_s1 + $0x234] sm:$0xf0]  ;;  %v3314_v57 = vld [vmem:[%s4083_s2 + $0x8] sm:$0xff] }
  0x36   :  { %491 = vmatpush.bf16.msrb.mxu1 %v1899_v35  ;;  %v2015_v35 = vor.u32 %v2652_v24, %v2012_v25  ;;  %v1996_v51 = vld [vmem:[%s4081_s1 + $0x238] sm:$0xf0]  ;;  %v62_v59 = vperm.slane %v3314_v57, 0  ;;  %v2066_v8 = vld [vmem:[%s4081_s1 + $0x2c0] sm:$0xf] }
  0x37   :  { %517 = vmatpush.bf16.msrb.mxu3 %v1903_v37  ;;  %v2669_v37 = vld [vmem:[%s4081_s1 + $0x2d4] sm:$0xf0]  ;;  %v1999_v54 = vor.u32 %v2648_v50, %v1996_v51  ;;  %v2667_v9 = vld [vmem:[%s4081_s1 + $0x2c4] sm:$0xf0]  ;;  %v2666_v10 = vld [vmem:[%s4081_s1 + $0x2c4] sm:$0xf] }
  0x38   :  { %479 = vmatpush.bf16.msrb.mxu0 %v1827_v30  ;;  %v2084_v30 = vld [vmem:[%s4081_s1 + $0x2e8] sm:$0xf0]  ;;  %v1986_v14 = vld [vmem:[%s4081_s1 + $0x220] sm:$0xf]  ;;  %v2646_v16 = vld [vmem:[%s4081_s1 + $0x224] sm:$0xf] }
  0x39   :  { %505 = vmatpush.bf16.msrb.mxu2 %v1831_v31  ;;  %v2011_v31 = vor.u32 %v2653_v23, %v2010_v22  ;;  %v2087_v32 = vor.u32 %v2670_v29, %v2084_v30  ;;  %v2068_v12 = vld [vmem:[%s4081_s1 + $0x2c8] sm:$0xf0]  ;;  %v2664_v23 = vld [vmem:[%s4081_s1 + $0x2b4] sm:$0xf]  ;;  %v2060_v24 = vld [vmem:[%s4081_s1 + $0x2b8] sm:$0xf0] }
  0x3a   :  { %492 = vmatpush.bf16.msrb.mxu1 %v1891_v47  ;;  %v1994_v47 = vld [vmem:[%s4081_s1 + $0x230] sm:$0xf]  ;;  %v2071_v13 = vor.u32 %v2666_v10, %v2068_v12  ;;  %v1988_v18 = vld [vmem:[%s4081_s1 + $0x228] sm:$0xf0]  ;;  %v2063_v25 = vor.u32 %v2664_v23, %v2060_v24  ;;  %v2645_v27 = vld [vmem:[%s4081_s1 + $0x214] sm:$0xf0] }
  0x3b   :  { %518 = vmatpush.bf16.msrb.mxu3 %v1895_v49  ;;  %v61_v49 = vperm.slane %v3296_v42, 0  ;;  %v1995_v52 = vor.u32 %v2649_v48, %v1994_v47  ;;  %v1978_v26 = vld [vmem:[%s4081_s1 + $0x210] sm:$0xf]  ;;  %v1980_v30 = vld [vmem:[%s4081_s1 + $0x218] sm:$0xf0] }
  0x3c   :  { %480 = vmatpush.bf16.msrb.mxu0 %v1819_v41  ;;  %v2076_v41 = vld [vmem:[%s4081_s1 + $0x2d8] sm:$0xf0]  ;;  %v1979_v29 = vor.u32 %v2645_v27, %v1978_v26  ;;  %v2663_v33 = vld [vmem:[%s4081_s1 + $0x2a4] sm:$0xf0]  ;;  %v2662_v34 = vld [vmem:[%s4081_s1 + $0x2a4] sm:$0xf] }
  0x3d   :  { %506 = vmatpush.bf16.msrb.mxu2 %v1823_v43  ;;  %v2075_v43 = vor.u32 %v2669_v37, %v2074_v36  ;;  %v2079_v44 = vor.u32 %v2668_v38, %v2076_v41  ;;  %v2052_v36 = vld [vmem:[%s4081_s1 + $0x2a8] sm:$0xf0]  ;;  %v1970_v38 = vld [vmem:[%s4081_s1 + $0x200] sm:$0xf]  ;;  %v2643_v39 = vld [vmem:[%s4081_s1 + $0x204] sm:$0xf0] }
  0x3e   :  { %493 = vmatpush.bf16.msrb.mxu1 %v1883_v58  ;;  %v2055_v37 = vor.u32 %v2662_v34, %v2052_v36  ;;  %v2642_v40 = vld [vmem:[%s4081_s1 + $0x204] sm:$0xf]  ;;  %v1971_v41 = vor.u32 %v2643_v39, %v1970_v38  ;;  %v2660_v48 = vld [vmem:[%s4081_s1 + $0x294] sm:$0xf]  ;;  %v2034_v51 = vld [vmem:[%s4081_s1 + $0x280] sm:$0xf] }
  0x3f   :  { %519 = vmatpush.bf16.msrb.mxu3 %v1887_v61  ;;  %v2186_v12 = vld [vmem:[%s4081_s1 + $0x370] sm:$0xf]  ;;  %v2180_v24 = vld [vmem:[%s4081_s1 + $0x368] sm:$0xf0]  ;;  %v2705_v26 = vld [vmem:[%s4081_s1 + $0x3f4] sm:$0xf0] }
  0x40   :  { %481 = vmatpush.bf16.msrb.mxu0 %v1811_v53  ;;  %v2704_v27 = vld [vmem:[%s4081_s1 + $0x3f4] sm:$0xf]  ;;  %v2170_v34 = vld [vmem:[%s4081_s1 + $0x350] sm:$0xf]  ;;  %v564_v38 = vperm.slane %v3314_v57, 2 }
  0x41   :  { %507 = vmatpush.bf16.msrb.mxu2 %v1815_v55  ;;  %v2684_v36 = vld [vmem:[%s4081_s1 + $0x354] sm:$0xf] }
  0x42   :  { %494 = vmatpush.bf16.msrb.mxu1 %v1875_v1 }
  0x43   :  { %520 = vmatpush.bf16.msrb.mxu3 %v1879_v3 }
  0x44   :  { %725 = vmatpush.bf16.msra.mxu0 %v2027_v7 }
  0x45   :  { %751 = vmatpush.bf16.msra.mxu2 %v2031_v11  ;;  %v2067_v11 = vor.u32 %v2667_v9, %v2066_v8 }
  0x46   :  { %738 = vmatpush.bf16.msra.mxu1 %v2091_v20  ;;  %v2665_v20 = vld [vmem:[%s4081_s1 + $0x2b4] sm:$0xf0] }
  0x47   :  { %764 = vmatpush.bf16.msra.mxu3 %v2095_v21  ;;  %v1991_v21 = vor.u32 %v2646_v16, %v1988_v18  ;;  %v2188_v16 = vld [vmem:[%s4081_s1 + $0x378] sm:$0xf0] }
  0x48   :  { %726 = vmatpush.bf16.msra.mxu0 %v2019_v15  ;;  %v2647_v15 = vld [vmem:[%s4081_s1 + $0x224] sm:$0xf0] }
  0x49   :  { %752 = vmatpush.bf16.msra.mxu2 %v2023_v19  ;;  %v1987_v17 = vor.u32 %v2647_v15, %v1986_v14  ;;  %v2058_v19 = vld [vmem:[%s4081_s1 + $0x2b0] sm:$0xf]  ;;  %v2688_v14 = vld [vmem:[%s4081_s1 + $0x374] sm:$0xf] }
  0x4a   :  { %739 = vmatpush.bf16.msra.mxu1 %v2083_v28  ;;  %v2059_v22 = vor.u32 %v2665_v20, %v2058_v19  ;;  %v2644_v28 = vld [vmem:[%s4081_s1 + $0x214] sm:$0xf]  ;;  %v2191_v18 = vor.u32 %v2688_v14, %v2188_v16  ;;  %v563_v19 = vperm.slane %v3296_v42, 2  ;;  %v2178_v20 = vld [vmem:[%s4081_s1 + $0x360] sm:$0xf] }
  0x4b   :  { %765 = vmatpush.bf16.msra.mxu3 %v2087_v32  ;;  %v2050_v32 = vld [vmem:[%s4081_s1 + $0x2a0] sm:$0xf]  ;;  %v2698_v16 = vld [vmem:[%s4081_s1 + $0x3c4] sm:$0xf] }
  0x4c   :  { %727 = vmatpush.bf16.msra.mxu0 %v2011_v31  ;;  %v1983_v31 = vor.u32 %v2644_v28, %v1980_v30  ;;  %v2252_v30 = vld [vmem:[%s4081_s1 + $0x3f8] sm:$0xf0] }
  0x4d   :  { %753 = vmatpush.bf16.msra.mxu2 %v2015_v35  ;;  %v2051_v35 = vor.u32 %v2663_v33, %v2050_v32  ;;  %v2255_v33 = vor.u32 %v2704_v27, %v2252_v30  ;;  %v2220_v30 = vld [vmem:[%s4081_s1 + $0x3b8] sm:$0xf0] }
  0x4e   :  { %740 = vmatpush.bf16.msra.mxu1 %v2075_v43  ;;  %v1972_v43 = vld [vmem:[%s4081_s1 + $0x208] sm:$0xf0] }
  0x4f   :  { %766 = vmatpush.bf16.msra.mxu3 %v2079_v44  ;;  %v1975_v44 = vor.u32 %v2642_v40, %v1972_v43  ;;  %v2172_v40 = vld [vmem:[%s4081_s1 + $0x358] sm:$0xf0] }
  0x50   :  { %728 = vmatpush.bf16.msra.mxu0 %v2003_v45  ;;  %v2042_v45 = vld [vmem:[%s4081_s1 + $0x290] sm:$0xf]  ;;  %v2175_v43 = vor.u32 %v2684_v36, %v2172_v40  ;;  %v20_v36 = vlaneseq  ;;  %v2140_v40 = vld [vmem:[%s4081_s1 + $0x318] sm:$0xf0] }
  0x51   :  { %754 = vmatpush.bf16.msra.mxu2 %v2007_v46  ;;  %v2661_v46 = vld [vmem:[%s4081_s1 + $0x294] sm:$0xf0] }
  0x52   :  { %741 = vmatpush.bf16.msra.mxu1 %v2067_v11  ;;  %v2043_v47 = vor.u32 %v2661_v46, %v2042_v45  ;;  %v2703_v45 = vld [vmem:[%s4081_s1 + $0x3e4] sm:$0xf0] }
  0x53   :  { %767 = vmatpush.bf16.msra.mxu3 %v2071_v13  ;;  %v2689_v13 = vld [vmem:[%s4081_s1 + $0x374] sm:$0xf0] }
  0x54   :  { %729 = vmatpush.bf16.msra.mxu0 %v1995_v52  ;;  %v2659_v52 = vld [vmem:[%s4081_s1 + $0x284] sm:$0xf0]  ;;  %v2187_v15 = vor.u32 %v2689_v13, %v2186_v12 }
  0x55   :  { %755 = vmatpush.bf16.msra.mxu2 %v1999_v54  ;;  %v2035_v54 = vor.u32 %v2659_v52, %v2034_v51  ;;  %v2683_v51 = vld [vmem:[%s4081_s1 + $0x344] sm:$0xf0]  ;;  %v2682_v52 = vld [vmem:[%s4081_s1 + $0x344] sm:$0xf] }
  0x56   :  { %742 = vmatpush.bf16.msra.mxu1 %v2059_v22  ;;  %v2686_v22 = vld [vmem:[%s4081_s1 + $0x364] sm:$0xf]  ;;  %v2699_v13 = vld [vmem:[%s4081_s1 + $0x3c4] sm:$0xf0] }
  0x57   :  { %768 = vmatpush.bf16.msra.mxu3 %v2063_v25  ;;  %v2250_v25 = vld [vmem:[%s4081_s1 + $0x3f0] sm:$0xf] }
  0x58   :  { %730 = vmatpush.bf16.msra.mxu0 %v1987_v17 }
  0x59   :  { %756 = vmatpush.bf16.msra.mxu2 %v1991_v21  ;;  %v2687_v21 = vld [vmem:[%s4081_s1 + $0x364] sm:$0xf0] }
  0x5a   :  { %743 = vmatpush.bf16.msra.mxu1 %v2051_v35  ;;  %v2179_v23 = vor.u32 %v2687_v21, %v2178_v20  ;;  %v2685_v35 = vld [vmem:[%s4081_s1 + $0x354] sm:$0xf0]  ;;  %v2679_v21 = vld [vmem:[%s4081_s1 + $0x324] sm:$0xf0] }
  0x5b   :  { %769 = vmatpush.bf16.msra.mxu3 %v2055_v37  ;;  %v2171_v39 = vor.u32 %v2685_v35, %v2170_v34  ;;  %v2677_v34 = vld [vmem:[%s4081_s1 + $0x314] sm:$0xf0]  ;;  %v2676_v35 = vld [vmem:[%s4081_s1 + $0x314] sm:$0xf] }
  0x5c   :  { %731 = vmatpush.bf16.msra.mxu0 %v1979_v29  ;;  %v2251_v29 = vor.u32 %v2705_v26, %v2250_v25  ;;  %v2697_v25 = vld [vmem:[%s4081_s1 + $0x3b4] sm:$0xf0] }
  0x5d   :  { %757 = vmatpush.bf16.msra.mxu2 %v1983_v31 }
  0x5e   :  { %744 = vmatpush.bf16.msra.mxu1 %v2043_v47 }
  0x60   :  { %732 = vmatpush.bf16.msra.mxu0 %v1971_v41 }
  0x61   :  { %758 = vmatpush.bf16.msra.mxu2 %v1975_v44  ;;  %v2242_v44 = vld [vmem:[%s4081_s1 + $0x3e0] sm:$0xf] }
  0x62   :  { %745 = vmatpush.bf16.msra.mxu1 %v2035_v54  ;;  %v2243_v47 = vor.u32 %v2703_v45, %v2242_v44 }
  0xa0   :  { %v232_v53 = vpop.f32.mrf.mxu0 }
  0xa1   :  { %v233_v55 = vadd.f32 %v232_v53, %v61_v49  ;;  %v245_v56 = vpop.f32.mrf.mxu1  ;;  %v2044_v49 = vld [vmem:[%s4081_s1 + $0x298] sm:$0xf0]  ;;  %v2658_v53 = vld [vmem:[%s4081_s1 + $0x284] sm:$0xf] }
  0xa2   :  { %v2047_v50 = vor.u32 %v2660_v48, %v2044_v49  ;;  %v2244_v48 = vld [vmem:[%s4081_s1 + $0x3e8] sm:$0xf0] }
  0xa3   :  { %v246_v58 = vadd.f32 %v245_v56, %v233_v55  ;;  %v2036_v55 = vld [vmem:[%s4081_s1 + $0x288] sm:$0xf0] }
  0xa4   :  { %770 = vmatpush.bf16.msra.mxu3 %v2047_v50  ;;  %v2039_v56 = vor.u32 %v2658_v53, %v2036_v55  ;;  %v2162_v50 = vld [vmem:[%s4081_s1 + $0x340] sm:$0xf] }
  0xa5   :  { %v275_v60 = vmax.f32 %v246_v58, 0.0  ;;  %v312_v58 = vperm.slane %v3296_v42, 1  ;;  %v2183_v42 = vor.u32 %v2686_v22, %v2180_v24  ;;  %v2163_v55 = vor.u32 %v2683_v51, %v2162_v50  ;;  %v2678_v22 = vld [vmem:[%s4081_s1 + $0x324] sm:$0xf]  ;;  %v2148_v24 = vld [vmem:[%s4081_s1 + $0x328] sm:$0xf0] }
  0xa6   :  { %v2151_v27 = vor.u32 %v2678_v22, %v2148_v24  ;;  %v2675_v50 = vld [vmem:[%s4081_s1 + $0x304] sm:$0xf0] }
  0xa7   :  { %v277_v61 = vpack.c.bf16 %v275_v60, %v275_v60 }
  0xa8   :  { %v271_v0 = vpop.f32.mrf.mxu3  ;;  %v234_v1 = vpop.f32.mrf.mxu0  ;;  %771 = vmatpush.bf16.msra.mxu3 %v2039_v56  ;;  %v2164_v56 = vld [vmem:[%s4081_s1 + $0x348] sm:$0xf0] }
  0xa9   :  { %v258_v62 = vpop.f32.mrf.mxu2  ;;  %v247_v2 = vpop.f32.mrf.mxu1  ;;  %482 = vmatmul.bf16.vlgmr.msrb.gmra.mxu0 %v277_v61  ;;  %508 = vmatmul.bf16.vlgmr.msrb.gmra.mxu2 %v277_v61  ;;  %v313_v61 = vperm.slane %v3314_v57, 1  ;;  %v2702_v57 = vld [vmem:[%s4081_s1 + $0x3e4] sm:$0xf] }
  0xaa   :  { %v259_v63 = vadd.f32 %v258_v62, %v62_v59  ;;  %1046 = vmatpush.bf16.msrb.mxu0 %v2187_v15  ;;  %1072 = vmatpush.bf16.msrb.mxu2 %v2191_v18  ;;  %v2247_v49 = vor.u32 %v2702_v57, %v2244_v48  ;;  %v2146_v18 = vld [vmem:[%s4081_s1 + $0x320] sm:$0xf]  ;;  %v2143_v57 = vor.u32 %v2676_v35, %v2140_v40  ;;  %v2212_v48 = vld [vmem:[%s4081_s1 + $0x3a8] sm:$0xf0]  ;;  %v2348_v35 = vld [vmem:[%s4081_s1 + $0x478] sm:$0xf0] }
  0xac   :  { %v272_v3 = vadd.f32 %v271_v0, %v259_v63 }
  0xae   :  { %v276_v4 = vmax.f32 %v272_v3, 0.0  ;;  %1047 = vmatpush.bf16.msrb.mxu0 %v2179_v23  ;;  %1073 = vmatpush.bf16.msrb.mxu2 %v2183_v42  ;;  %v2147_v23 = vor.u32 %v2679_v21, %v2146_v18  ;;  %v2218_v42 = vld [vmem:[%s4081_s1 + $0x3b0] sm:$0xf] }
  0xb0   :  { %v278_v5 = vpack.c.bf16 %v276_v4, %v276_v4  ;;  %v273_v7 = vpop.f32.mrf.mxu3 }
  0xb1   :  { %v260_v6 = vpop.f32.mrf.mxu2 }
  0xb2   :  { %495 = vmatmul.bf16.vlgmr.msrb.gmra.mxu1 %v278_v5  ;;  %521 = vmatmul.bf16.vlgmr.msrb.gmra.mxu3 %v278_v5 }
  0xb3   :  { %1059 = vmatpush.bf16.msrb.mxu1 %v2251_v29  ;;  %1085 = vmatpush.bf16.msrb.mxu3 %v2255_v33  ;;  %v2696_v29 = vld [vmem:[%s4081_s1 + $0x3b4] sm:$0xf]  ;;  %v2138_v33 = vld [vmem:[%s4081_s1 + $0x310] sm:$0xf] }
  0xb4   :  { %1048 = vmatpush.bf16.msrb.mxu0 %v2171_v39  ;;  %1074 = vmatpush.bf16.msrb.mxu2 %v2175_v43  ;;  %v2139_v39 = vor.u32 %v2677_v34, %v2138_v33  ;;  %v2695_v43 = vld [vmem:[%s4081_s1 + $0x3a4] sm:$0xf0] }
  0xb7   :  { %1060 = vmatpush.bf16.msrb.mxu1 %v2243_v47  ;;  %1086 = vmatpush.bf16.msrb.mxu3 %v2247_v49  ;;  %v2130_v49 = vld [vmem:[%s4081_s1 + $0x300] sm:$0xf] }
  0xb8   :  { %1049 = vmatpush.bf16.msrb.mxu0 %v2163_v55  ;;  %v2132_v55 = vld [vmem:[%s4081_s1 + $0x308] sm:$0xf0] }
 0x126   :  { %v483_v59 = vpop.f32.mrf.mxu0 }
 0x127   :  { %v484_v60 = vadd.f32 %v483_v59, %v312_v58  ;;  %v2234_v58 = vld [vmem:[%s4081_s1 + $0x3d0] sm:$0xf] }
 0x12c   :  { %v509_v62 = vpop.f32.mrf.mxu2 }
 0x12d   :  { %v510_v3 = vadd.f32 %v509_v62, %v313_v61  ;;  %v2701_v61 = vld [vmem:[%s4081_s1 + $0x3d4] sm:$0xf0]  ;;  %v2700_v62 = vld [vmem:[%s4081_s1 + $0x3d4] sm:$0xf] }
 0x12e   :  { %v485_v1 = vpop.f32.mrf.mxu0 }
 0x12f   :  { %v496_v63 = vpop.f32.mrf.mxu1 }
 0x130   :  { %v497_v0 = vadd.f32 %v496_v63, %v484_v60  ;;  %v2167_v60 = vor.u32 %v2682_v52, %v2164_v56  ;;  %v2236_v63 = vld [vmem:[%s4081_s1 + $0x3d8] sm:$0xf0]  ;;  %v2674_v52 = vld [vmem:[%s4081_s1 + $0x304] sm:$0xf]  ;;  %v2202_v56 = vld [vmem:[%s4081_s1 + $0x390] sm:$0xf] }
 0x132   :  { %v526_v2 = vmax.f32 %v497_v0, 0.0  ;;  %1075 = vmatpush.bf16.msrb.mxu2 %v2167_v60  ;;  %v2692_v60 = vld [vmem:[%s4081_s1 + $0x394] sm:$0xf] }
 0x134   :  { %v528_v4 = vpack.c.bf16 %v526_v2, %v526_v2  ;;  %v511_v7 = vpop.f32.mrf.mxu2  ;;  %v2235_v2 = vor.u32 %v2701_v61, %v2234_v58  ;;  %v2693_v58 = vld [vmem:[%s4081_s1 + $0x394] sm:$0xf0]  ;;  %v2204_v61 = vld [vmem:[%s4081_s1 + $0x398] sm:$0xf0] }
 0x135   :  { %v522_v5 = vpop.f32.mrf.mxu3 }
 0x136   :  { %v523_v6 = vadd.f32 %v522_v5, %v510_v3  ;;  %733 = vmatmul.bf16.vlgmr.msra.gmra.mxu0 %v528_v4  ;;  %759 = vmatmul.bf16.vlgmr.msra.gmra.mxu2 %v528_v4  ;;  %v2239_v3 = vor.u32 %v2700_v62, %v2236_v63  ;;  %v2154_v4 = vld [vmem:[%s4081_s1 + $0x330] sm:$0xf]  ;;  %v2681_v5 = vld [vmem:[%s4081_s1 + $0x334] sm:$0xf0] }
 0x137   :  { %v498_v8 = vpop.f32.mrf.mxu1  ;;  %1061 = vmatpush.bf16.msrb.mxu1 %v2235_v2  ;;  %v2203_v2 = vor.u32 %v2693_v58, %v2202_v56  ;;  %v2716_v56 = vld [vmem:[%s4081_s1 + $0x454] sm:$0xf]  ;;  %v2332_v58 = vld [vmem:[%s4081_s1 + $0x458] sm:$0xf0] }
 0x138   :  { %v527_v9 = vmax.f32 %v523_v6, 0.0  ;;  %v2155_v8 = vor.u32 %v2681_v5, %v2154_v4  ;;  %1087 = vmatpush.bf16.msrb.mxu3 %v2239_v3  ;;  %v2207_v5 = vor.u32 %v2692_v60, %v2204_v61  ;;  %v2735_v61 = vld [vmem:[%s4081_s1 + $0x4e4] sm:$0xf0] }
 0x13a   :  { %v529_v10 = vpack.c.bf16 %v527_v9, %v527_v9  ;;  %v2680_v9 = vld [vmem:[%s4081_s1 + $0x334] sm:$0xf]  ;;  %1050 = vmatpush.bf16.msrb.mxu0 %v2155_v8 }
 0x13c   :  { %746 = vmatmul.bf16.vlgmr.msra.gmra.mxu1 %v529_v10  ;;  %772 = vmatmul.bf16.vlgmr.msra.gmra.mxu3 %v529_v10  ;;  %v2156_v10 = vld [vmem:[%s4081_s1 + $0x338] sm:$0xf0] }
 0x13d   :  { %v524_v11 = vpop.f32.mrf.mxu3  ;;  %v2159_v14 = vor.u32 %v2680_v9, %v2156_v10 }
 0x13e   :  { %v2226_v11 = vld [vmem:[%s4081_s1 + $0x3c0] sm:$0xf]  ;;  %1051 = vmatpush.bf16.msrb.mxu0 %v2147_v23 }
 0x13f   :  { %v2227_v15 = vor.u32 %v2699_v13, %v2226_v11  ;;  %1076 = vmatpush.bf16.msrb.mxu2 %v2159_v14  ;;  %v2194_v13 = vld [vmem:[%s4081_s1 + $0x380] sm:$0xf]  ;;  %v2691_v14 = vld [vmem:[%s4081_s1 + $0x384] sm:$0xf0] }
 0x141   :  { %1062 = vmatpush.bf16.msrb.mxu1 %v2227_v15  ;;  %v2195_v15 = vor.u32 %v2691_v14, %v2194_v13  ;;  %v2396_v13 = vld [vmem:[%s4081_s1 + $0x4d8] sm:$0xf0] }
 0x142   :  { %1052 = vmatpush.bf16.msrb.mxu0 %v2139_v39 }
 0x143   :  { %1077 = vmatpush.bf16.msrb.mxu2 %v2151_v27 }
 0x147   :  { %1078 = vmatpush.bf16.msrb.mxu2 %v2143_v57  ;;  %v2737_v57 = vld [vmem:[%s4081_s1 + $0x4f4] sm:$0xf0] }
 0x1b3   :  { %v734_v17 = vpop.f32.mrf.mxu0 }
 0x1b4   :  { %v735_v28 = vadd.f32 %v734_v17, %v563_v19  ;;  %v2228_v17 = vld [vmem:[%s4081_s1 + $0x3c8] sm:$0xf0] }
 0x1b5   :  { %v2231_v20 = vor.u32 %v2698_v16, %v2228_v17  ;;  %v2690_v16 = vld [vmem:[%s4081_s1 + $0x384] sm:$0xf]  ;;  %v2196_v17 = vld [vmem:[%s4081_s1 + $0x388] sm:$0xf0] }
 0x1b7   :  { %1088 = vmatpush.bf16.msrb.mxu3 %v2231_v20  ;;  %v2199_v20 = vor.u32 %v2690_v16, %v2196_v17 }
 0x1b9   :  { %v747_v31 = vpop.f32.mrf.mxu1  ;;  %v760_v32 = vpop.f32.mrf.mxu2 }
 0x1ba   :  { %v3461_v37 = vadd.f32 %v747_v31, %v735_v28  ;;  %v761_v54 = vadd.f32 %v760_v32, %v564_v38  ;;  %v2219_v28 = vor.u32 %v2697_v25, %v2218_v42  ;;  %v2223_v32 = vor.u32 %v2696_v29, %v2220_v30  ;;  %v2346_v30 = vld [vmem:[%s4081_s1 + $0x470] sm:$0xf] }
 0x1bb   :  { %v736_v41 = vpop.f32.mrf.mxu0 }
 0x1bc   :  { %v783_v46 = vand.u32 2147483647, %v3461_v37  ;;  %v2210_v41 = vld [vmem:[%s4081_s1 + $0x3a0] sm:$0xf]  ;;  %1063 = vmatpush.bf16.msrb.mxu1 %v2219_v28  ;;  %1089 = vmatpush.bf16.msrb.mxu3 %v2223_v32  ;;  %v777_v8 = vmax.f32 %v3461_v37, 0.0  ;;  %vm779_vm2 = vcmp.ne.f32.partialorder %v3461_v37, %v3461_v37 }
 0x1bd   :  { %v2211_v47 = vor.u32 %v2695_v43, %v2210_v41  ;;  %v2720_v32 = vld [vmem:[%s4081_s1 + $0x474] sm:$0xf]  ;;  %v2718_v41 = vld [vmem:[%s4081_s1 + $0x464] sm:$0xf]  ;;  %v2340_v43 = vld [vmem:[%s4081_s1 + $0x468] sm:$0xf0] }
 0x1be   :  { %v785_v53 = vsub.f32 0.0, %v783_v46  ;;  %v2694_v46 = vld [vmem:[%s4081_s1 + $0x3a4] sm:$0xf]  ;;  %v2351_v40 = vor.u32 %v2720_v32, %v2348_v35 }
 0x1bf   :  { %v773_v59 = vpop.f32.mrf.mxu3  ;;  %v2215_v51 = vor.u32 %v2694_v46, %v2212_v48  ;;  %v2736_v46 = vld [vmem:[%s4081_s1 + $0x4f4] sm:$0xf] }
 0x1c0   :  { %v787_v0 = vmul.f32 1.442695, %v785_v53  ;;  %v3504_v1 = vadd.f32 %v773_v59, %v761_v54  ;;  %v21_v53 = vand.u32 127, %v20_v36  ;;  %v2131_v54 = vor.u32 %v2675_v50, %v2130_v49  ;;  %1064 = vmatpush.bf16.msrb.mxu1 %v2211_v47  ;;  %v2338_v36 = vld [vmem:[%s4081_s1 + $0x460] sm:$0xf] }
 0x1c1   :  { %v749_v6 = vpop.f32.mrf.mxu1  ;;  %v762_v7 = vpop.f32.mrf.mxu2  ;;  %v2135_v59 = vor.u32 %v2674_v52, %v2132_v55  ;;  %1090 = vmatpush.bf16.msrb.mxu3 %v2215_v51  ;;  %v2412_v47 = vld [vmem:[%s4081_s1 + $0x4f8] sm:$0xf0]  ;;  %v2343_v49 = vor.u32 %v2718_v41, %v2340_v43  ;;  %v2330_v52 = vld [vmem:[%s4081_s1 + $0x450] sm:$0xf] }
 0x1c2   :  { %2770 = vpow2.f32 %v787_v0  ;;  %v784_v12 = vand.u32 2147483647, %v3504_v1  ;;  %v22_v62 = vadd.s32 128, %v21_v53  ;;  %1053 = vmatpush.bf16.msrb.mxu0 %v2131_v54  ;;  %v23_v9 = vand.u32 15, %v21_v53  ;;  %v2717_v53 = vld [vmem:[%s4081_s1 + $0x454] sm:$0xf0] }
 0x1c3   :  { %1079 = vmatpush.bf16.msrb.mxu2 %v2135_v59  ;;  %v778_v25 = vmax.f32 %v3504_v1, 0.0  ;;  %vm780_vm5 = vcmp.ne.f32.partialorder %v3504_v1, %v3504_v1  ;;  %v2415_v51 = vor.u32 %v2736_v46, %v2412_v47  ;;  %v2402_v59 = vld [vmem:[%s4081_s1 + $0x4e0] sm:$0xf]  ;;  %v2791_v47 = vld [vmem:[%s4082_s0 + $0x8] sm:$0xff] }
 0x1c4   :  { %v786_v19 = vsub.f32 0.0, %v784_v12  ;;  %v24_v10 = vand.u32 15, %v22_v62  ;;  %1065 = vmatpush.bf16.msrb.mxu1 %v2203_v2  ;;  %vm3616_vm1 = vcmp.lt.s32.totalorder %v23_v9, 8  ;;  %v2734_v62 = vld [vmem:[%s4081_s1 + $0x4e4] sm:$0xf] }
 0x1c5   :  { %1091 = vmatpush.bf16.msrb.mxu3 %v2207_v5  ;;  %v2404_v2 = vld [vmem:[%s4081_s1 + $0x4e8] sm:$0xf0] }
 0x1c6   :  { %v789_v26 = vmul.f32 1.442695, %v786_v19  ;;  %vm3626_vm3 = vcmp.lt.s32.totalorder %v24_v10, 8  ;;  %v2324_v9 = vld [vmem:[%s4081_s1 + $0x448] sm:$0xf0] }
 0x1c7   :  { %v775_v31 = vpop.f32.mrf.mxu3  ;;  %1323 = vmatpush.bf16.msra.mxu2 %v2351_v40  ;;  %v2394_v10 = vld [vmem:[%s4081_s1 + $0x4d0] sm:$0xf] }
 0x1c8   :  { %v2771_v38 = vpop.eup %2770  ;;  %2772 = vpow2.f32 %v789_v26  ;;  %1066 = vmatpush.bf16.msrb.mxu1 %v2195_v15  ;;  %v2721_v31 = vld [vmem:[%s4081_s1 + $0x474] sm:$0xf0] }
 0x1c9   :  { %v791_v44 = vadd.f32 1.0, %v2771_v38  ;;  %v794_v45 = vmul.f32 -0.5, %v2771_v38  ;;  %v797_v3 = vand.u32 2147483647, %v2771_v38  ;;  %1092 = vmatpush.bf16.msrb.mxu3 %v2199_v20  ;;  %v2347_v34 = vor.u32 %v2721_v31, %v2346_v30 }
 0x1cb   :  { %2774 = vlog2.f32 %v791_v44  ;;  %v795_v0 = vadd.f32 1.0, %v794_v45  ;;  %vm798_vm0 = vcmp.lt.f32.partialorder %v797_v3, 0.0004427343  ;;  %v2410_v44 = vld [vmem:[%s4081_s1 + $0x4f0] sm:$0xf]  ;;  %1297 = vmatpush.bf16.msra.mxu0 %v2347_v34  ;;  %1324 = vmatpush.bf16.msra.mxu2 %v2343_v49 }
 0x1cc   :  { %v2411_v50 = vor.u32 %v2737_v57, %v2410_v44  ;;  %v2322_v3 = vld [vmem:[%s4081_s1 + $0x440] sm:$0xf] }
 0x1cd   :  { %v796_v12 = vmul.f32 %v2771_v38, %v795_v0  ;;  %v2719_v38 = vld [vmem:[%s4081_s1 + $0x464] sm:$0xf0]  ;;  %1336 = vmatpush.bf16.msra.mxu3 %v2415_v51  ;;  %v2403_v0 = vor.u32 %v2735_v61, %v2402_v59  ;;  %v2730_v51 = vld [vmem:[%s4081_s1 + $0x4c4] sm:$0xf]  ;;  %v2378_v59 = vld [vmem:[%s4081_s1 + $0x4b0] sm:$0xf] }
 0x1ce   :  { %v2773_v63 = vpop.eup %2772  ;;  %v2339_v45 = vor.u32 %v2719_v38, %v2338_v36  ;;  %1310 = vmatpush.bf16.msra.mxu1 %v2411_v50  ;;  %v2386_v50 = vld [vmem:[%s4081_s1 + $0x4c0] sm:$0xf] }
 0x1cf   :  { %v800_v4 = vadd.f32 1.0, %v2773_v63  ;;  %v803_v6 = vmul.f32 -0.5, %v2773_v63  ;;  %v806_v22 = vand.u32 2147483647, %v2773_v63 }
 0x1d0   :  { %1298 = vmatpush.bf16.msra.mxu0 %v2339_v45 }
 0x1d1   :  { %v2775_v7 = vpop.eup %2774  ;;  %2776 = vlog2.f32 %v800_v4  ;;  %v804_v19 = vadd.f32 1.0, %v803_v6  ;;  %vm807_vm4 = vcmp.lt.f32.partialorder %v806_v22, 0.0004427343  ;;  %v2715_v4 = vld [vmem:[%s4081_s1 + $0x444] sm:$0xf0]  ;;  %v2335_v6 = vor.u32 %v2716_v56, %v2332_v58 }
 0x1d2   :  { %v793_v11 = vmul.f32 0.6931472, %v2775_v7  ;;  %v2407_v7 = vor.u32 %v2734_v62, %v2404_v2  ;;  %1311 = vmatpush.bf16.msra.mxu1 %v2403_v0  ;;  %v2314_v22 = vld [vmem:[%s4081_s1 + $0x430] sm:$0xf]  ;;  %v2308_v58 = vld [vmem:[%s4081_s1 + $0x428] sm:$0xf0] }
 0x1d3   :  { %v805_v28 = vmul.f32 %v2773_v63, %v804_v19  ;;  %v2331_v63 = vor.u32 %v2717_v53, %v2330_v52  ;;  %1325 = vmatpush.bf16.msra.mxu2 %v2335_v6  ;;  %v2306_v53 = vld [vmem:[%s4081_s1 + $0x420] sm:$0xf]  ;;  %v2380_v0 = vld [vmem:[%s4081_s1 + $0x4b8] sm:$0xf0] }
 0x1d4   :  { %v799_v18 = vsel %vm798_vm0, %v796_v12, %v793_v11  ;;  %v2733_v11 = vld [vmem:[%s4081_s1 + $0x4d4] sm:$0xf0]  ;;  %v2732_v12 = vld [vmem:[%s4081_s1 + $0x4d4] sm:$0xf]  ;;  %1337 = vmatpush.bf16.msra.mxu3 %v2407_v7  ;;  %v2300_v7 = vld [vmem:[%s4081_s1 + $0x418] sm:$0xf0] }
 0x1d5   :  { %v809_v21 = vadd.f32 %v799_v18, %v777_v8  ;;  %v2714_v8 = vld [vmem:[%s4081_s1 + $0x444] sm:$0xf]  ;;  %v2395_v15 = vor.u32 %v2733_v11, %v2394_v10  ;;  %v2399_v16 = vor.u32 %v2732_v12, %v2396_v13  ;;  %1299 = vmatpush.bf16.msra.mxu0 %v2331_v63  ;;  %v2323_v18 = vor.u32 %v2715_v4, %v2322_v3  ;;  %v2728_v63 = vld [vmem:[%s4081_s1 + $0x4b4] sm:$0xf]  ;;  %v2298_v3 = vld [vmem:[%s4081_s1 + $0x410] sm:$0xf] }
 0x1d6   :  { %v2383_v2 = vor.u32 %v2728_v63, %v2380_v0  ;;  %v2709_v4 = vld [vmem:[%s4081_s1 + $0x414] sm:$0xf0]  ;;  %v2727_v10 = vld [vmem:[%s4081_s1 + $0x4a4] sm:$0xf0]  ;;  %v2726_v12 = vld [vmem:[%s4081_s1 + $0x4a4] sm:$0xf] }
 0x1d7   :  { %v2777_v24 = vpop.eup %2776  ;;  %v3623_v42 = vsel %vm779_vm2, %v3461_v37, %v809_v21  ;;  %v2327_v21 = vor.u32 %v2714_v8, %v2324_v9  ;;  %1312 = vmatpush.bf16.msra.mxu1 %v2395_v15  ;;  %v2299_v6 = vor.u32 %v2709_v4, %v2298_v3  ;;  %v2370_v9 = vld [vmem:[%s4081_s1 + $0x4a0] sm:$0xf]  ;;  %v2372_v13 = vld [vmem:[%s4081_s1 + $0x4a8] sm:$0xf0]  ;;  %v2554_v0 = vld [vmem:[%s4081_s1 + $0x5d0] sm:$0xf] }
 0x1d8   :  { %2778 = vrsqrt.f32 %v3623_v42  ;;  %v802_v27 = vmul.f32 0.6931472, %v2777_v24  ;;  %v817_v29 = vsel %vm3616_vm1, %v3461_v37, %v3623_v42  ;;  %v2713_v24 = vld [vmem:[%s4081_s1 + $0x434] sm:$0xf0]  ;;  %1338 = vmatpush.bf16.msra.mxu3 %v2399_v16  ;;  %vm828_vm6 = vcmp.eq.f32.partialorder %v3623_v42, inf }
 0x1d9   :  { %819 = vst [vmem:[%s4084_s4] sm:$0xff] %v817_v29  ;;  %1300 = vmatpush.bf16.msra.mxu0 %v2323_v18  ;;  %v2315_v30 = vor.u32 %v2713_v24, %v2314_v22  ;;  %1326 = vmatpush.bf16.msra.mxu2 %v2327_v21  ;;  %v831_v34 = vand.u32 2147483648, %v3623_v42  ;;  %vm830_vm7 = vcmp.eq.f32.partialorder %v3623_v42, 0.0  ;;  %v2371_v11 = vor.u32 %v2727_v10, %v2370_v9  ;;  %v2290_v15 = vld [vmem:[%s4081_s1 + $0x400] sm:$0xf]  ;;  %v2707_v16 = vld [vmem:[%s4081_s1 + $0x404] sm:$0xf0] }
 0x1da   :  { %v808_v33 = vsel %vm807_vm4, %v805_v28, %v802_v27  ;;  %v2316_v27 = vld [vmem:[%s4081_s1 + $0x438] sm:$0xf0]  ;;  %v2291_v18 = vor.u32 %v2707_v16, %v2290_v15  ;;  %v2362_v21 = vld [vmem:[%s4081_s1 + $0x490] sm:$0xf]  ;;  %v2725_v22 = vld [vmem:[%s4081_s1 + $0x494] sm:$0xf0] }
 0x1db   :  { %v810_v39 = vadd.f32 %v808_v33, %v778_v25  ;;  %v2712_v25 = vld [vmem:[%s4081_s1 + $0x434] sm:$0xf]  ;;  %v2746_v4 = vld [vmem:[%s4081_s1 + $0x544] sm:$0xf] }
 0x1dc   :  { %v2319_v33 = vor.u32 %v2712_v25, %v2316_v27  ;;  %v2724_v24 = vld [vmem:[%s4081_s1 + $0x494] sm:$0xf]  ;;  %v2363_v25 = vor.u32 %v2725_v22, %v2362_v21  ;;  %v2364_v27 = vld [vmem:[%s4081_s1 + $0x498] sm:$0xf0] }
 0x1dd   :  { %v3677_v48 = vsel %vm780_vm5, %v3504_v1, %v810_v39  ;;  %1301 = vmatpush.bf16.msra.mxu0 %v2315_v30  ;;  %v2790_v39 = vld [vmem:[%s4082_s0] sm:$0xff]  ;;  %v2723_v30 = vld [vmem:[%s4081_s1 + $0x484] sm:$0xf0]  ;;  %v2764_v3 = vld [vmem:[%s4081_s1 + $0x5d4] sm:$0xf] }
 0x1de   :  { %v2779_v54 = vpop.eup %2778  ;;  %2780 = vrsqrt.f32 %v3677_v48  ;;  %v818_v55 = vsel %vm3626_vm3, %v3504_v1, %v3677_v48  ;;  %1327 = vmatpush.bf16.msra.mxu2 %v2319_v33  ;;  %vm840_vm8 = vcmp.eq.f32.partialorder %v3677_v48, inf  ;;  %vm842_vm9 = vcmp.eq.f32.partialorder %v3677_v48, 0.0  ;;  %v2356_v33 = vld [vmem:[%s4081_s1 + $0x488] sm:$0xf0]  ;;  %v2744_v16 = vld [vmem:[%s4081_s1 + $0x534] sm:$0xf] }
 0x1df   :  { %v822_v60 = vmul.f32 %v2779_v54, %v3623_v42  ;;  %820 = vst [vmem:[%s4084_s4 + $0x8] sm:$0xff] %v818_v55  ;;  %v2710_v55 = vld [vmem:[%s4081_s1 + $0x424] sm:$0xf] }
 0x1e0   :  { %v2311_v61 = vor.u32 %v2710_v55, %v2308_v58  ;;  %v2564_v58 = vld [vmem:[%s4081_s1 + $0x5e8] sm:$0xf0] }
 0x1e1   :  { %v823_v5 = vmul.f32 %v2779_v54, %v822_v60  ;;  %v2729_v60 = vld [vmem:[%s4081_s1 + $0x4b4] sm:$0xf0] }
 0x1e2   :  { %v2379_v62 = vor.u32 %v2729_v60, %v2378_v59  ;;  %1328 = vmatpush.bf16.msra.mxu2 %v2311_v61  ;;  %v2482_v61 = vld [vmem:[%s4081_s1 + $0x540] sm:$0xf] }
 0x1e3   :  { %v824_v14 = vmul.f32 0.5, %v823_v5  ;;  %v2708_v5 = vld [vmem:[%s4081_s1 + $0x414] sm:$0xf] }
 0x1e4   :  { %v2781_v17 = vpop.eup %2780  ;;  %v2303_v8 = vor.u32 %v2708_v5, %v2300_v7  ;;  %v2484_v5 = vld [vmem:[%s4081_s1 + $0x548] sm:$0xf0] }
 0x1e5   :  { %v825_v19 = vsub.f32 1.5, %v824_v14  ;;  %v834_v20 = vmul.f32 %v2781_v17, %v3677_v48  ;;  %v2375_v14 = vor.u32 %v2726_v12, %v2372_v13  ;;  %v2474_v12 = vld [vmem:[%s4081_s1 + $0x530] sm:$0xf]  ;;  %v2745_v13 = vld [vmem:[%s4081_s1 + $0x534] sm:$0xf0] }
 0x1e6   :  { %1329 = vmatpush.bf16.msra.mxu2 %v2303_v8 }
 0x1e7   :  { %v826_v28 = vmul.f32 %v2779_v54, %v825_v19  ;;  %v835_v29 = vmul.f32 %v2781_v17, %v834_v20  ;;  %v2711_v54 = vld [vmem:[%s4081_s1 + $0x424] sm:$0xf0]  ;;  %v2292_v19 = vld [vmem:[%s4081_s1 + $0x408] sm:$0xf0] }
 0x1e8   :  { %v2307_v56 = vor.u32 %v2711_v54, %v2306_v53  ;;  %v2562_v53 = vld [vmem:[%s4081_s1 + $0x5e0] sm:$0xf]  ;;  %v2767_v54 = vld [vmem:[%s4081_s1 + $0x5e4] sm:$0xf0] }
 0x1e9   :  { %v827_v31 = vmul.f32 %v826_v28, %v3623_v42  ;;  %v836_v32 = vmul.f32 0.5, %v835_v29  ;;  %v2367_v28 = vor.u32 %v2724_v24, %v2364_v27  ;;  %v2354_v29 = vld [vmem:[%s4081_s1 + $0x480] sm:$0xf]  ;;  %v2563_v55 = vor.u32 %v2767_v54, %v2562_v53  ;;  %v2458_v53 = vld [vmem:[%s4081_s1 + $0x510] sm:$0xf] }
 0x1ea   :  { %1302 = vmatpush.bf16.msra.mxu0 %v2307_v56  ;;  %v2766_v56 = vld [vmem:[%s4081_s1 + $0x5e4] sm:$0xf]  ;;  %v2741_v54 = vld [vmem:[%s4081_s1 + $0x514] sm:$0xf0] }
 0x1eb   :  { %v829_v35 = vsel %vm828_vm6, %v3623_v42, %v827_v31  ;;  %v837_v36 = vsub.f32 1.5, %v836_v32  ;;  %v843_v42 = vand.u32 2147483648, %v3677_v48  ;;  %v2722_v31 = vld [vmem:[%s4081_s1 + $0x484] sm:$0xf]  ;;  %v2355_v32 = vor.u32 %v2723_v30, %v2354_v29 }
 0x1ec   :  { %v832_v38 = vsel %vm830_vm7, %v831_v34, %v829_v35  ;;  %v2359_v34 = vor.u32 %v2722_v31, %v2356_v33  ;;  %v2506_v35 = vld [vmem:[%s4081_s1 + $0x570] sm:$0xf]  ;;  %v2567_v60 = vor.u32 %v2766_v56, %v2564_v58  ;;  %v2459_v56 = vor.u32 %v2741_v54, %v2458_v53  ;;  %v2460_v58 = vld [vmem:[%s4081_s1 + $0x518] sm:$0xf0] }
 0x1ed   :  { %v845_v40 = vmul.f32 %v2790_v39, %v832_v38  ;;  %v838_v41 = vmul.f32 %v2781_v17, %v837_v36  ;;  %v2706_v17 = vld [vmem:[%s4081_s1 + $0x404] sm:$0xf]  ;;  %v2753_v36 = vld [vmem:[%s4081_s1 + $0x574] sm:$0xf0]  ;;  %v2752_v38 = vld [vmem:[%s4081_s1 + $0x574] sm:$0xf] }
 0x1ee   :  { %1303 = vmatpush.bf16.msra.mxu0 %v2299_v6  ;;  %v2295_v20 = vor.u32 %v2706_v17, %v2292_v19  ;;  %v2507_v39 = vor.u32 %v2753_v36, %v2506_v35  ;;  %v2556_v6 = vld [vmem:[%s4081_s1 + $0x5d8] sm:$0xf0] }
 0x1ef   :  { %v847_v43 = vsel %vm3616_vm1, %v3461_v37, %v845_v40  ;;  %v839_v44 = vmul.f32 %v838_v41, %v3677_v48  ;;  %v2508_v40 = vld [vmem:[%s4081_s1 + $0x578] sm:$0xf0]  ;;  %v2498_v41 = vld [vmem:[%s4081_s1 + $0x560] sm:$0xf]  ;;  %v2559_v8 = vor.u32 %v2764_v3, %v2556_v6 }
 0x1f0   :  { %v849_v45 = vpack.c.bf16 %v847_v43, %v847_v43  ;;  %1330 = vmatpush.bf16.msra.mxu2 %v2295_v20  ;;  %v2751_v43 = vld [vmem:[%s4081_s1 + $0x564] sm:$0xf0]  ;;  %v2476_v17 = vld [vmem:[%s4081_s1 + $0x538] sm:$0xf0]  ;;  %v2450_v3 = vld [vmem:[%s4081_s1 + $0x500] sm:$0xf] }
 0x1f1   :  { %v841_v57 = vsel %vm840_vm8, %v3677_v48, %v839_v44  ;;  %v2731_v48 = vld [vmem:[%s4081_s1 + $0x4c4] sm:$0xf0]  ;;  %v2511_v44 = vor.u32 %v2752_v38, %v2508_v40  ;;  %v2479_v19 = vor.u32 %v2744_v16, %v2476_v17  ;;  %v2546_v40 = vld [vmem:[%s4081_s1 + $0x5c0] sm:$0xf] }
 0x1f2   :  { %1054 = vmatmul.bf16.vlgmr.msrb.gmra.mxu0 %v849_v45  ;;  %1080 = vmatmul.bf16.vlgmr.msrb.gmra.mxu2 %v849_v45  ;;  %v844_v46 = vsel %vm842_vm9, %v843_v42, %v841_v57  ;;  %v2387_v52 = vor.u32 %v2731_v48, %v2386_v50  ;;  %v2750_v45 = vld [vmem:[%s4081_s1 + $0x564] sm:$0xf]  ;;  %v2500_v42 = vld [vmem:[%s4081_s1 + $0x568] sm:$0xf0]  ;;  %v2570_v57 = vld [vmem:[%s4081_s1 + $0x5f0] sm:$0xf] }
 0x1f3   :  { %v846_v23 = vmul.f32 %v2791_v47, %v844_v46  ;;  %1304 = vmatpush.bf16.msra.mxu0 %v2291_v18  ;;  %v2499_v46 = vor.u32 %v2751_v43, %v2498_v41  ;;  %v2769_v47 = vld [vmem:[%s4081_s1 + $0x5f4] sm:$0xf0]  ;;  %v2475_v18 = vor.u32 %v2745_v13, %v2474_v12  ;;  %v2763_v41 = vld [vmem:[%s4081_s1 + $0x5c4] sm:$0xf0]  ;;  %v2762_v43 = vld [vmem:[%s4081_s1 + $0x5c4] sm:$0xf] }
 0x1f4   :  { %1313 = vmatpush.bf16.msra.mxu1 %v2387_v52  ;;  %1574 = vmatpush.bf16.msrb.mxu2 %v2511_v44  ;;  %v2571_v50 = vor.u32 %v2769_v47, %v2570_v57  ;;  %v2749_v52 = vld [vmem:[%s4081_s1 + $0x554] sm:$0xf0]  ;;  %v2547_v44 = vor.u32 %v2763_v41, %v2546_v40  ;;  %v2466_v57 = vld [vmem:[%s4081_s1 + $0x520] sm:$0xf]  ;;  %v2742_v47 = vld [vmem:[%s4081_s1 + $0x524] sm:$0xf] }
 0x1f5   :  { %v848_v37 = vsel %vm3626_vm3, %v3504_v1, %v846_v23  ;;  %v2388_v1 = vld [vmem:[%s4081_s1 + $0x4c8] sm:$0xf0]  ;;  %v2768_v23 = vld [vmem:[%s4081_s1 + $0x5f4] sm:$0xf]  ;;  %v2524_v13 = vld [vmem:[%s4081_s1 + $0x598] sm:$0xf0] }
 0x1f6   :  { %v850_v49 = vpack.c.bf16 %v848_v37, %v848_v37  ;;  %v2391_v26 = vor.u32 %v2730_v51, %v2388_v1  ;;  %v2572_v37 = vld [vmem:[%s4081_s1 + $0x5f8] sm:$0xf0]  ;;  %v2490_v51 = vld [vmem:[%s4081_s1 + $0x550] sm:$0xf]  ;;  %v2748_v1 = vld [vmem:[%s4081_s1 + $0x554] sm:$0xf] }
 0x1f7   :  { %1548 = vmatpush.bf16.msrb.mxu0 %v2507_v39  ;;  %v2575_v48 = vor.u32 %v2768_v23, %v2572_v37  ;;  %v2491_v59 = vor.u32 %v2749_v52, %v2490_v51  ;;  %v2468_v37 = vld [vmem:[%s4081_s1 + $0x528] sm:$0xf0]  ;;  %v2760_v52 = vld [vmem:[%s4081_s1 + $0x5b4] sm:$0xf]  ;;  %v2514_v16 = vld [vmem:[%s4081_s1 + $0x580] sm:$0xf] }
 0x1f8   :  { %1067 = vmatmul.bf16.vlgmr.msrb.gmra.mxu1 %v850_v49  ;;  %1093 = vmatmul.bf16.vlgmr.msrb.gmra.mxu3 %v850_v49  ;;  %v2503_v49 = vor.u32 %v2750_v45, %v2500_v42  ;;  %v2548_v45 = vld [vmem:[%s4081_s1 + $0x5c8] sm:$0xf0]  ;;  %v2755_v17 = vld [vmem:[%s4081_s1 + $0x584] sm:$0xf0] }
 0x1f9   :  { %1339 = vmatpush.bf16.msra.mxu3 %v2391_v26  ;;  %1314 = vmatpush.bf16.msra.mxu1 %v2379_v62  ;;  %v2492_v26 = vld [vmem:[%s4081_s1 + $0x558] sm:$0xf0]  ;;  %v2747_v62 = vld [vmem:[%s4081_s1 + $0x544] sm:$0xf0]  ;;  %v2551_v42 = vor.u32 %v2762_v43, %v2548_v45 }
 0x1fa   :  { %1575 = vmatpush.bf16.msrb.mxu2 %v2503_v49  ;;  %v2495_v63 = vor.u32 %v2748_v1, %v2492_v26  ;;  %v2483_v9 = vor.u32 %v2747_v62, %v2482_v61  ;;  %v2538_v49 = vld [vmem:[%s4081_s1 + $0x5b0] sm:$0xf]  ;;  %v2540_v1 = vld [vmem:[%s4081_s1 + $0x5b8] sm:$0xf0]  ;;  %v2759_v61 = vld [vmem:[%s4081_s1 + $0x5a4] sm:$0xf0] }
 0x1fb   :  { %1549 = vmatpush.bf16.msrb.mxu0 %v2499_v46  ;;  %v2743_v46 = vld [vmem:[%s4081_s1 + $0x524] sm:$0xf0]  ;;  %v2543_v26 = vor.u32 %v2760_v52, %v2540_v1 }
 0x1fc   :  { %v2467_v23 = vor.u32 %v2743_v46, %v2466_v57 }
 0x1fd   :  { %1340 = vmatpush.bf16.msra.mxu3 %v2383_v2  ;;  %1315 = vmatpush.bf16.msra.mxu1 %v2371_v11  ;;  %v2765_v2 = vld [vmem:[%s4081_s1 + $0x5d4] sm:$0xf0]  ;;  %v2487_v11 = vor.u32 %v2746_v4, %v2484_v5  ;;  %v2739_v4 = vld [vmem:[%s4081_s1 + $0x504] sm:$0xf0]  ;;  %v2738_v5 = vld [vmem:[%s4081_s1 + $0x504] sm:$0xf] }
 0x1fe   :  { %v2555_v7 = vor.u32 %v2765_v2, %v2554_v0  ;;  %1576 = vmatpush.bf16.msrb.mxu2 %v2495_v63  ;;  %v2758_v63 = vld [vmem:[%s4081_s1 + $0x5a4] sm:$0xf]  ;;  %v2532_v0 = vld [vmem:[%s4081_s1 + $0x5a8] sm:$0xf0]  ;;  %v2451_v6 = vor.u32 %v2739_v4, %v2450_v3 }
 0x1ff   :  { %1550 = vmatpush.bf16.msrb.mxu0 %v2491_v59  ;;  %v2535_v2 = vor.u32 %v2758_v63, %v2532_v0 }
 0x201   :  { %1341 = vmatpush.bf16.msra.mxu3 %v2375_v14  ;;  %1316 = vmatpush.bf16.msra.mxu1 %v2363_v25  ;;  %v3960_v14 = vld [vmem:[%s4083_s2] sm:$0xff]  ;;  %v3972_v25 = vld [vmem:[%s4083_s2 + $0x8] sm:$0xff] }
 0x202   :  { %v884_v15 = vperm.slane %v3960_v14, 3  ;;  %1577 = vmatpush.bf16.msrb.mxu2 %v2487_v11  ;;  %v885_v27 = vperm.slane %v3972_v25, 3  ;;  %v2756_v11 = vld [vmem:[%s4081_s1 + $0x594] sm:$0xf] }
 0x203   :  { %1551 = vmatpush.bf16.msrb.mxu0 %v2483_v9  ;;  %v2522_v9 = vld [vmem:[%s4081_s1 + $0x590] sm:$0xf] }
 0x205   :  { %1342 = vmatpush.bf16.msra.mxu3 %v2367_v28  ;;  %1317 = vmatpush.bf16.msra.mxu1 %v2355_v32 }
 0x206   :  { %1578 = vmatpush.bf16.msrb.mxu2 %v2479_v19  ;;  %v2515_v19 = vor.u32 %v2755_v17, %v2514_v16 }
 0x207   :  { %1552 = vmatpush.bf16.msrb.mxu0 %v2475_v18  ;;  %v2754_v18 = vld [vmem:[%s4081_s1 + $0x584] sm:$0xf] }
 0x209   :  { %1343 = vmatpush.bf16.msra.mxu3 %v2359_v34  ;;  %1561 = vmatpush.bf16.msrb.mxu1 %v2571_v50  ;;  %v2761_v50 = vld [vmem:[%s4081_s1 + $0x5b4] sm:$0xf0] }
 0x20a   :  { %v2539_v51 = vor.u32 %v2761_v50, %v2538_v49 }
 0x20b   :  { %1553 = vmatpush.bf16.msrb.mxu0 %v2467_v23 }
 0x20d   :  { %1587 = vmatpush.bf16.msrb.mxu3 %v2575_v48  ;;  %1562 = vmatpush.bf16.msrb.mxu1 %v2563_v55  ;;  %v2471_v48 = vor.u32 %v2742_v47, %v2468_v37  ;;  %v2740_v55 = vld [vmem:[%s4081_s1 + $0x514] sm:$0xf]  ;;  %v1387_v37 = vperm.slane %v3972_v25, 5 }
 0x20e   :  { %v2463_v59 = vor.u32 %v2740_v55, %v2460_v58 }
 0x20f   :  { %1579 = vmatpush.bf16.msrb.mxu2 %v2471_v48  ;;  %1554 = vmatpush.bf16.msrb.mxu0 %v2459_v56 }
 0x211   :  { %1588 = vmatpush.bf16.msrb.mxu3 %v2567_v60  ;;  %1563 = vmatpush.bf16.msrb.mxu1 %v2555_v7  ;;  %v2530_v60 = vld [vmem:[%s4081_s1 + $0x5a0] sm:$0xf]  ;;  %v2452_v7 = vld [vmem:[%s4081_s1 + $0x508] sm:$0xf0] }
 0x212   :  { %v2531_v62 = vor.u32 %v2759_v61, %v2530_v60 }
 0x213   :  { %1580 = vmatpush.bf16.msrb.mxu2 %v2463_v59  ;;  %1555 = vmatpush.bf16.msrb.mxu0 %v2451_v6 }
 0x215   :  { %1589 = vmatpush.bf16.msrb.mxu3 %v2559_v8  ;;  %1564 = vmatpush.bf16.msrb.mxu1 %v2547_v44  ;;  %v2455_v8 = vor.u32 %v2738_v5, %v2452_v7 }
 0x217   :  { %1581 = vmatpush.bf16.msrb.mxu2 %v2455_v8 }
 0x219   :  { %1590 = vmatpush.bf16.msrb.mxu3 %v2551_v42  ;;  %1565 = vmatpush.bf16.msrb.mxu1 %v2539_v51  ;;  %v1386_v42 = vperm.slane %v3960_v14, 5 }
 0x21d   :  { %1591 = vmatpush.bf16.msrb.mxu3 %v2543_v26  ;;  %1566 = vmatpush.bf16.msrb.mxu1 %v2531_v62 }
 0x221   :  { %1592 = vmatpush.bf16.msrb.mxu3 %v2535_v2 }
 0x26f   :  { %v1055_v10 = vpop.f32.mrf.mxu0 }
 0x270   :  { %v1056_v20 = vadd.f32 %v1055_v10, %v884_v15  ;;  %v2757_v10 = vld [vmem:[%s4081_s1 + $0x594] sm:$0xf0]  ;;  %v2527_v15 = vor.u32 %v2756_v11, %v2524_v13 }
 0x271   :  { %v2523_v12 = vor.u32 %v2757_v10, %v2522_v9 }
 0x272   :  { %1593 = vmatpush.bf16.msrb.mxu3 %v2527_v15 }
 0x273   :  { %1567 = vmatpush.bf16.msrb.mxu1 %v2523_v12 }
 0x275   :  { %v1068_v21 = vpop.f32.mrf.mxu1  ;;  %v1081_v22 = vpop.f32.mrf.mxu2 }
 0x276   :  { %v1069_v24 = vadd.f32 %v1068_v21, %v1056_v20  ;;  %v1082_v31 = vadd.f32 %v1081_v22, %v885_v27  ;;  %v2516_v20 = vld [vmem:[%s4081_s1 + $0x588] sm:$0xf0] }
 0x277   :  { %v1057_v28 = vpop.f32.mrf.mxu0  ;;  %v2519_v21 = vor.u32 %v2754_v18, %v2516_v20  ;;  %1568 = vmatpush.bf16.msrb.mxu1 %v2515_v19 }
 0x278   :  { %v1098_v29 = vmax.f32 %v1069_v24, 0.0  ;;  %v1135_v24 = vperm.slane %v3960_v14, 4 }
 0x279   :  { %1594 = vmatpush.bf16.msrb.mxu3 %v2519_v21 }
 0x27a   :  { %v1100_v30 = vpack.c.bf16 %v1098_v29, %v1098_v29 }
 0x27b   :  { %v1094_v32 = vpop.f32.mrf.mxu3 }
 0x27c   :  { %v1095_v33 = vadd.f32 %v1094_v32, %v1082_v31  ;;  %1305 = vmatmul.bf16.vlgmr.msra.gmra.mxu0 %v1100_v30  ;;  %1331 = vmatmul.bf16.vlgmr.msra.gmra.mxu2 %v1100_v30  ;;  %v1136_v31 = vperm.slane %v3972_v25, 4 }
 0x27d   :  { %v1070_v34 = vpop.f32.mrf.mxu1  ;;  %v1083_v35 = vpop.f32.mrf.mxu2 }
 0x27e   :  { %v1099_v36 = vmax.f32 %v1095_v33, 0.0 }
 0x280   :  { %v1101_v38 = vpack.c.bf16 %v1099_v36, %v1099_v36 }
 0x282   :  { %1318 = vmatmul.bf16.vlgmr.msra.gmra.mxu1 %v1101_v38  ;;  %1344 = vmatmul.bf16.vlgmr.msra.gmra.mxu3 %v1101_v38 }
 0x283   :  { %v1096_v39 = vpop.f32.mrf.mxu3 }
 0x2f9   :  { %v1306_v22 = vpop.f32.mrf.mxu0 }
 0x2fa   :  { %v1307_v27 = vadd.f32 %v1306_v22, %v1135_v24 }
 0x2ff   :  { %v1319_v28 = vpop.f32.mrf.mxu1  ;;  %v1332_v29 = vpop.f32.mrf.mxu2 }
 0x300   :  { %v1320_v30 = vadd.f32 %v1319_v28, %v1307_v27  ;;  %v1333_v35 = vadd.f32 %v1332_v29, %v1136_v31 }
 0x301   :  { %v1308_v32 = vpop.f32.mrf.mxu0 }
 0x302   :  { %v1349_v33 = vmax.f32 %v1320_v30, 0.0 }
 0x304   :  { %v1351_v34 = vpack.c.bf16 %v1349_v33, %v1349_v33 }
 0x305   :  { %v1345_v36 = vpop.f32.mrf.mxu3 }
 0x306   :  { %v1346_v38 = vadd.f32 %v1345_v36, %v1333_v35  ;;  %1556 = vmatmul.bf16.vlgmr.msrb.gmra.mxu0 %v1351_v34  ;;  %1582 = vmatmul.bf16.vlgmr.msrb.gmra.mxu2 %v1351_v34 }
 0x307   :  { %v1321_v39 = vpop.f32.mrf.mxu1  ;;  %v1334_v40 = vpop.f32.mrf.mxu2 }
 0x308   :  { %v1350_v41 = vmax.f32 %v1346_v38, 0.0 }
 0x30a   :  { %v1352_v43 = vpack.c.bf16 %v1350_v41, %v1350_v41 }
 0x30c   :  { %1569 = vmatmul.bf16.vlgmr.msrb.gmra.mxu1 %v1352_v43  ;;  %1595 = vmatmul.bf16.vlgmr.msrb.gmra.mxu3 %v1352_v43 }
 0x30d   :  { %v1347_v44 = vpop.f32.mrf.mxu3 }
 0x383   :  { %v1557_v45 = vpop.f32.mrf.mxu0 }
 0x384   :  { %v1558_v57 = vadd.f32 %v1557_v45, %v1386_v42 }
 0x389   :  { %v1570_v46 = vpop.f32.mrf.mxu1  ;;  %v1583_v47 = vpop.f32.mrf.mxu2 }
 0x38a   :  { %v1571_v23 = vadd.f32 %v1570_v46, %v1558_v57  ;;  %v1584_v48 = vadd.f32 %v1583_v47, %v1387_v37 }
 0x38b   :  { %v1559_v49 = vpop.f32.mrf.mxu0 }
 0x38c   :  { %v2576_v50 = vmul.f32 -1.442695, %v1571_v23 }
 0x38e   :  { %2782 = vpow2.f32 %v2576_v50 }
 0x38f   :  { %v1596_v51 = vpop.f32.mrf.mxu3 }
 0x390   :  { %v1597_v52 = vadd.f32 %v1596_v51, %v1584_v48 }
 0x391   :  { %v1572_v1 = vpop.f32.mrf.mxu1  ;;  %v1585_v26 = vpop.f32.mrf.mxu2 }
 0x392   :  { %v2577_v53 = vmul.f32 -1.442695, %v1597_v52 }
 0x394   :  { %v2783_v54 = vpop.eup %2782  ;;  %2784 = vpow2.f32 %v2577_v53 }
 0x395   :  { %v1606_v55 = vadd.f32 1.0, %v2783_v54 }
 0x397   :  { %2786 = vrcp.f32 %v1606_v55  ;;  %v1598_v14 = vpop.f32.mrf.mxu3  ;;  %v1619_v61 = vand.u32 2147483648, %v1606_v55  ;;  %v1617_v63 = vand.u32 2147483647, %v1606_v55  ;;  %vm1613_vm11 = vweird.f32 %v1606_v55 }
 0x399   :  { %v1620_v4 = vor.u32 1.1754944e-38, %v1619_v61  ;;  %vm1618_vm13 = vcmp.eq.f32.partialorder %v1617_v63, 8.507059e+37 }
 0x39a   :  { %v2785_v56 = vpop.eup %2784 }
 0x39b   :  { %v1607_v58 = vadd.f32 1.0, %v2785_v56 }
 0x39d   :  { %v2787_v59 = vpop.eup %2786  ;;  %2788 = vrcp.f32 %v1607_v58  ;;  %v1634_v8 = vand.u32 2147483648, %v1607_v58  ;;  %v1632_v10 = vand.u32 2147483647, %v1607_v58  ;;  %vm1628_vm15 = vweird.f32 %v1607_v58 }
 0x39e   :  { %v1609_v60 = vmul.f32 %v2787_v59, %v1606_v55  ;;  %vm1614_vm10 = vweird.f32 %v2787_v59 }
 0x39f   :  { %vm1615_vm12 = vmor %vm1613_vm11, %vm1614_vm10  ;;  %v1635_v12 = vor.u32 1.1754944e-38, %v1634_v8  ;;  %vm1633_vm1 = vcmp.eq.f32.partialorder %v1632_v10, 8.507059e+37 }
 0x3a0   :  { %v1610_v25 = vsub.f32 1.0, %v1609_v60 }
 0x3a2   :  { %v1611_v62 = vmul.f32 %v2787_v59, %v1610_v25 }
 0x3a3   :  { %v2789_v0 = vpop.eup %2788 }
 0x3a4   :  { %v1612_v2 = vadd.f32 %v2787_v59, %v1611_v62  ;;  %v1624_v3 = vmul.f32 %v2789_v0, %v1607_v58  ;;  %vm1629_vm14 = vweird.f32 %v2789_v0 }
 0x3a5   :  { %vm1630_vm0 = vmor %vm1628_vm15, %vm1629_vm14 }
 0x3a6   :  { %v1616_v5 = vsel %vm1615_vm12, %v2787_v59, %v1612_v2  ;;  %v1625_v6 = vsub.f32 1.0, %v1624_v3 }
 0x3a7   :  { %v1621_v7 = vsel %vm1618_vm13, %v1620_v4, %v1616_v5 }
 0x3a8   :  { %1638 = vst [vmem:[%s4085_s3] sm:$0xff] %v1621_v7  ;;  %v1626_v9 = vmul.f32 %v2789_v0, %v1625_v6 }
 0x3aa   :  { %v1627_v11 = vadd.f32 %v2789_v0, %v1626_v9 }
 0x3ac   :  { %v1631_v13 = vsel %vm1630_vm0, %v2789_v0, %v1627_v11 }
 0x3ad   :  { %v1636_v15 = vsel %vm1633_vm1, %v1635_v12, %v1631_v13 }
 0x3ae   :  { %1639 = vst [vmem:[%s4085_s3 + $0x8] sm:$0xff] %v1636_v15 }

</bundles_post_ra>
